<compile_context>
chip_gen: v7x
topology: tpu7x:2x2x1
jax: 0.10.0
libtpu: 0.0.40
codegen_flags: <defaults>
</compile_context>

<pallas_src>
import functools

import jax
import jax.numpy as jnp
from jax.experimental import pallas as pl
from jax.experimental.pallas import tpu as pltpu

COMPUTE_DTYPE = jnp.bfloat16  # MXU operands; accumulation stays float32.


# ------------------------------ Pallas kernel --------------------------------

def _banded_conv_kernel(*refs, taps, relu, has_add):
    """Row-banded conv:  o[r, :] = sum_t x[phase_t][off_t + r, :] @ w[t]  (+ add).

    x_ref : (P, Hq, K)      row-phases of the (padded) input, K = Wp*C lanes
    w_ref : (T, K, Wo*F)    banded per-row-tap weight matrices
    o_ref : (Ho, Wo*F)      lane-dense output rows
    add   : (Ho, Wo*F)      optional fused elementwise add (FPN use_elewadd)
    """
    if has_add:
        x_ref, add_ref, w_ref, o_ref = refs
    else:
        x_ref, w_ref, o_ref = refs
    ho = o_ref.shape[0]
    acc = jnp.zeros(o_ref.shape, jnp.float32)
    for t, (phase, off) in enumerate(taps):              # unrolled (<= 3 taps)
        xt = x_ref[phase][off:off + ho, :]               # contiguous slice, no im2col
        acc = acc + jnp.dot(xt, w_ref[t], preferred_element_type=jnp.float32)
    if has_add:
        acc = acc + add_ref[...].astype(jnp.float32)     # fused lateral merge
    if relu:
        acc = jnp.maximum(acc, 0.0)
    o_ref[...] = acc.astype(o_ref.dtype)


def _banded_conv(x_phases, w_banded, taps, out_rows, out_cols, add=None, relu=False):
    """x_phases: (N, P, Hq, K); w_banded: (T, K, out_cols) -> (N, out_rows, out_cols)."""
    n, p, hq, k = x_phases.shape
    t = w_banded.shape[0]
    assert w_banded.shape == (t, k, out_cols) and len(taps) == t

    in_specs = [pl.BlockSpec((None, p, hq, k), lambda i: (i, 0, 0, 0))]
    args = [x_phases]
    if add is not None:
        in_specs.append(pl.BlockSpec((None, out_rows, out_cols), lambda i: (i, 0, 0)))
        args.append(add)
    in_specs.append(pl.BlockSpec((t, k, out_cols), lambda i: (0, 0, 0)))
    args.append(w_banded)

    return pl.pallas_call(
        functools.partial(_banded_conv_kernel, taps=tuple(taps), relu=relu,
                          has_add=add is not None),
        out_shape=jax.ShapeDtypeStruct((n, out_rows, out_cols), x_phases.dtype),
        grid=(n,),
        in_specs=in_specs,
        out_specs=pl.BlockSpec((None, out_rows, out_cols), lambda i: (i, 0, 0)),
        compiler_params=pltpu.CompilerParams(dimension_semantics=("parallel",)),
    )(*args)


# -------------------------- banded-weight builders ----------------------------

def _band_3x3(w, w_in, stride):
    """w: (3,3,C,F) HWIO -> (3, (w_in+2)*C, Wo*F) per-row-tap banded matrices.

    B[kh][(stride*j + kw)*C + c, j*F + f] = w[kh, kw, c, f]; folds the kw taps and
    the W-stride into the contraction so the kernel only loops over 3 row taps.
    """
    c, f = int(w.shape[2]), int(w.shape[3])
    wp = w_in + 2
    wo = (w_in + 2 - 3) // stride + 1
    cols = jnp.arange(wo)
    bands = []
    for kh in range(3):
        b = jnp.zeros((wp * c, wo * f), w.dtype)
        for kw in range(3):
            place = jnp.zeros((wp, wo), w.dtype).at[stride * cols + kw, cols].set(1.0)
            b = b + jnp.kron(place, w[kh, kw])
        bands.append(b)
    return jnp.stack(bands)


def _band_1x1(w, w_in):
    """w: (C,F) -> (1, w_in*C, w_in*F) block-diagonal matrix (lane-dense 1x1 conv)."""
    return jnp.kron(jnp.eye(w_in, dtype=w.dtype), w)[None]


def _pad_and_phase(xf, c, stride):
    """xf: (N, H, W*C) row-flattened NHWC.  Pads spatially by 1 and splits rows
    into `stride` phases so every row tap is a contiguous in-kernel slice.
    Returns (N, P, Hq, (W+2)*C) and the static (phase, row_offset) per tap."""
    _, h, _ = xf.shape
    xp = jnp.pad(xf, ((0, 0), (1, 1), (c, c)))
    if stride == 1:
        return xp[:, None], ((0, 0), (0, 1), (0, 2))
    assert stride == 2 and (h + 2) % 2 == 0
    phases = jnp.stack([xp[:, 0::2, :], xp[:, 1::2, :]], axis=1)
    return phases, ((0, 0), (1, 0), (0, 1))


# ------------------------------ conv wrappers ---------------------------------

def conv3x3_flat(xf, w, c, w_in, stride=1, relu=False):
    """nn.Conv2d(c, f, 3, stride, padding=1, bias=False) on row-flattened NHWC."""
    _, h, wc = xf.shape
    assert wc == w_in * c
    ho = (h + 2 - 3) // stride + 1
    wo = (w_in + 2 - 3) // stride + 1
    f = int(w.shape[-1])
    x_phases, taps = _pad_and_phase(xf, c, stride)
    wb = _band_3x3(w, w_in, stride).astype(COMPUTE_DTYPE)
    y = _banded_conv(x_phases.astype(COMPUTE_DTYPE), wb, taps, ho, wo * f, relu=relu)
    return y, ho, wo


def conv1x1_add_flat(xf, w, c, w_in, add=None):
    """nn.Conv2d(c, f, 1, bias=False) lateral conv with the FPN add fused in."""
    _, h, wc = xf.shape
    assert wc == w_in * c
    f = int(w.shape[-1])
    wb = _band_1x1(w, w_in).astype(COMPUTE_DTYPE)
    add = None if add is None else add.astype(COMPUTE_DTYPE)
    return _banded_conv(xf.astype(COMPUTE_DTYPE)[:, None], wb, ((0, 0),),
                        h, w_in * f, add=add)


def _upsample2x_flat(yf, f):
    """Nearest 2x upsample in the row-flattened layout (wrapper-side data movement).
    TODO(synk): F.interpolate(size=...) also supports non-integer ratios; FPN
    stage sizes here are exact powers of two so nearest == 2x repeat."""
    n, h, wf = yf.shape
    w = wf // f
    y = yf.reshape(n, h, w, f)
    y = jnp.repeat(jnp.repeat(y, 2, axis=1), 2, axis=2)
    return y.reshape(n, 2 * h, 2 * w * f)


# ------------------------- FPNFeatureExpander forward -------------------------

def fpn_feature_expander_forward(x_nchw, params):
    """FPNFeatureExpander.forward with use_1x1=use_upsample=use_elewadd=True,
    use_bias=False, use_relu=False, norm_layer=None, top_blocks=LastLevelMaxPool."""
    n, c_in, h, w = x_nchw.shape
    xf = jnp.transpose(x_nchw, (0, 2, 3, 1)).reshape(n, h, w * c_in).astype(COMPUTE_DTYPE)

    # self.features (synthetic stand-in for parse_network): stride-2 conv + relu stages.
    feats = []
    cur, cc, ww = xf, c_in, w
    for wb in params["backbone"]:
        cur, hh, ww = conv3x3_flat(cur, wb, cc, ww, stride=2, relu=True)
        cc = int(wb.shape[-1])
        feats.append((cur, cc, hh, ww))

    num = len(feats)
    outputs = []
    y, f_prev = None, None
    for i in range(num - 1, -1, -1):
        feat_i, ci, hi, wi = feats[i]
        f_i = int(params["extras1"][i].shape[-1])
        if i == num - 1:
            y = conv1x1_add_flat(feat_i, params["extras1"][i], ci, wi)       # extras1
        else:
            y_up = _upsample2x_flat(y, f_prev)                               # use_upsample
            y = conv1x1_add_flat(feat_i, params["extras1"][i], ci, wi,
                                 add=y_up)                                   # add fused
        f_prev = f_i
        out_i, _, _ = conv3x3_flat(y, params["extras2"][i], f_i, wi, stride=1)  # extras2
        outputs.append((out_i, hi, wi, f_i))
    outputs = outputs[::-1]

    results = []
    for of, hi, wi, f_i in outputs:
        o = of.astype(jnp.float32).reshape(n, hi, wi, f_i)
        results.append(jnp.transpose(o, (0, 3, 1, 2)))                       # NHWC -> NCHW
    # LastLevelMaxPool: F.max_pool2d(x, 1, 2, 0) == stride-2 subsample (window = 1).
    results.append(results[-1][:, :, ::2, ::2])
    return results


# --------------------------------- parameters ---------------------------------

def init_params(key, in_ch, channels, num_filters):
    params = {"backbone": [], "extras1": [], "extras2": []}
    c_prev = in_ch
    for c in channels:
        key, k = jax.random.split(key)
        s = 1.0 / jnp.sqrt(9.0 * c_prev)
        params["backbone"].append(
            jax.random.uniform(k, (3, 3, c_prev, c), jnp.float32, -s, s))
        c_prev = c
    for c, f in zip(channels, num_filters):
        key, k1 = jax.random.split(key)
        key, k2 = jax.random.split(key)
        s1 = 1.0 / jnp.sqrt(float(c))
        s3 = 1.0 / jnp.sqrt(9.0 * f)
        params["extras1"].append(jax.random.uniform(k1, (c, f), jnp.float32, -s1, s1))
        params["extras2"].append(jax.random.uniform(k2, (3, 3, f, f), jnp.float32, -s3, s3))
    return params


# ----------------------------- XLA reference (check) --------------------------

def _conv_ref(x, w, stride, pad):
    return jax.lax.conv_general_dilated(
        x, w, window_strides=(stride, stride),
        padding=[(pad, pad), (pad, pad)],
        dimension_numbers=("NHWC", "HWIO", "NHWC"))


def reference_forward(x_nchw, params):
    x = jnp.transpose(x_nchw, (0, 2, 3, 1))
    feats = []
    h = x
    for wb in params["backbone"]:
        h = jax.nn.relu(_conv_ref(h, wb, 2, 1))
        feats.append(h)
    num = len(feats)
    outs, y = [], None
    for i in range(num - 1, -1, -1):
        bf = _conv_ref(feats[i], params["extras1"][i][None, None], 1, 0)
        if i == num - 1:
            y = bf
        else:
            y = bf + jnp.repeat(jnp.repeat(y, 2, axis=1), 2, axis=2)
        outs.append(_conv_ref(y, params["extras2"][i], 1, 1))
    outs = outs[::-1]
    outs.append(outs[-1][:, ::2, ::2, :])
    return [jnp.transpose(o, (0, 3, 1, 2)) for o in outs]


# ------------------------------------ main ------------------------------------

if __name__ == "__main__":
    key = jax.random.PRNGKey(0)
    key, kx = jax.random.split(key)

    N, Cin, H, W = 2, 3, 32, 32
    channels = [8, 16, 32]        # backbone feature channels (c3, c4, c5)
    num_filters = [16, 16, 16]    # FPN pyramid channels

    x = jax.random.normal(kx, (N, Cin, H, W), jnp.float32)
    params = init_params(key, Cin, channels, num_filters)

    outs = jax.jit(fpn_feature_expander_forward)(x, params)
    for o in outs:
        jax.block_until_ready(o)

    # expected shapes (NCHW): (2,16,16,16), (2,16,8,8), (2,16,4,4), (2,16,2,2)
    assert [tuple(o.shape) for o in outs] == [
        (2, 16, 16, 16), (2, 16, 8, 8), (2, 16, 4, 4), (2, 16, 2, 2)]

    # numerical sanity check vs an XLA conv reference (loose: bf16 operands).
    refs = jax.jit(reference_forward)(x, params)
    for o, r in zip(outs, refs):
        err = float(jnp.max(jnp.abs(o - r)))
        scale = float(jnp.max(jnp.abs(r)))
        assert err <= 5e-2 * (1.0 + scale), (err, scale)

    print("KERNEL_OK")
</pallas_src>

<mosaic_0001>
module attributes {stable_mosaic.version = 11 : i64} {
  func.func @_banded_conv_kernel(%arg0: i32, %arg1: memref<1x2x17x102xbf16, #tpu.memory_space<vmem>>, %arg2: memref<3x102x128xbf16, #tpu.memory_space<vmem>>, %arg3: memref<1x16x128xbf16, #tpu.memory_space<vmem>>) attributes {dimension_semantics = [#tpu.dimension_semantics<parallel>], iteration_bounds = array<i64: 2>, scalar_prefetch = 0 : i64, scratch_operands = 0 : i64, tpu.core_type = #tpu.core_type<tc>, window_params = [{transform_indices = @transform_0, window_bounds = array<i64: 1, 2, 17, 102>}, {pipeline_mode = #tpu.pipeline_mode<synchronous>, transform_indices = @transform_1, window_bounds = array<i64: 3, 102, 128>}, {transform_indices = @transform_2, window_bounds = array<i64: 1, 16, 128>}]} {
    %cst = arith.constant 0.000000e+00 : f32
    %0 = vector.broadcast %cst : f32 to vector<16x128xf32>
    %c0 = arith.constant 0 : index
    %c0_0 = arith.constant 0 : index
    %c0_1 = arith.constant 0 : index
    %c0_2 = arith.constant 0 : index
    %1 = vector.load %arg1[%c0, %c0_0, %c0_1, %c0_2] : memref<1x2x17x102xbf16, #tpu.memory_space<vmem>>, vector<1x1x17x102xbf16>
    %2 = vector.shape_cast %1 : vector<1x1x17x102xbf16> to vector<17x102xbf16>
    %3 = vector.extract_strided_slice %2 {offsets = [0, 0], sizes = [16, 102], strides = [1, 1]} : vector<17x102xbf16> to vector<16x102xbf16>
    %c0_3 = arith.constant 0 : index
    %c0_4 = arith.constant 0 : index
    %c0_5 = arith.constant 0 : index
    %4 = vector.load %arg2[%c0_3, %c0_4, %c0_5] : memref<3x102x128xbf16, #tpu.memory_space<vmem>>, vector<1x102x128xbf16>
    %5 = vector.shape_cast %4 : vector<1x102x128xbf16> to vector<102x128xbf16>
    %cst_6 = arith.constant dense<0.000000e+00> : vector<16x128xf32>
    %6 = tpu.matmul %3, %5, %cst_6 {dimension_numbers = #tpu.dot_dimension_numbers<[1], [0], [0], [1], [0, 0, 1, 1], [], []>} : vector<16x102xbf16>, vector<102x128xbf16>, vector<16x128xf32> -> vector<16x128xf32>
    %7 = arith.addf %0, %6 : vector<16x128xf32>
    %c0_7 = arith.constant 0 : index
    %c1 = arith.constant 1 : index
    %c0_8 = arith.constant 0 : index
    %c0_9 = arith.constant 0 : index
    %8 = vector.load %arg1[%c0_7, %c1, %c0_8, %c0_9] : memref<1x2x17x102xbf16, #tpu.memory_space<vmem>>, vector<1x1x17x102xbf16>
    %9 = vector.shape_cast %8 : vector<1x1x17x102xbf16> to vector<17x102xbf16>
    %10 = vector.extract_strided_slice %9 {offsets = [0, 0], sizes = [16, 102], strides = [1, 1]} : vector<17x102xbf16> to vector<16x102xbf16>
    %c1_10 = arith.constant 1 : index
    %c0_11 = arith.constant 0 : index
    %c0_12 = arith.constant 0 : index
    %11 = vector.load %arg2[%c1_10, %c0_11, %c0_12] : memref<3x102x128xbf16, #tpu.memory_space<vmem>>, vector<1x102x128xbf16>
    %12 = vector.shape_cast %11 : vector<1x102x128xbf16> to vector<102x128xbf16>
    %cst_13 = arith.constant dense<0.000000e+00> : vector<16x128xf32>
    %13 = tpu.matmul %10, %12, %cst_13 {dimension_numbers = #tpu.dot_dimension_numbers<[1], [0], [0], [1], [0, 0, 1, 1], [], []>} : vector<16x102xbf16>, vector<102x128xbf16>, vector<16x128xf32> -> vector<16x128xf32>
    %14 = arith.addf %7, %13 : vector<16x128xf32>
    %c0_14 = arith.constant 0 : index
    %c0_15 = arith.constant 0 : index
    %c0_16 = arith.constant 0 : index
    %c0_17 = arith.constant 0 : index
    %15 = vector.load %arg1[%c0_14, %c0_15, %c0_16, %c0_17] : memref<1x2x17x102xbf16, #tpu.memory_space<vmem>>, vector<1x1x17x102xbf16>
    %16 = vector.shape_cast %15 : vector<1x1x17x102xbf16> to vector<17x102xbf16>
    %17 = vector.extract_strided_slice %16 {offsets = [1, 0], sizes = [16, 102], strides = [1, 1]} : vector<17x102xbf16> to vector<16x102xbf16>
    %c2 = arith.constant 2 : index
    %c0_18 = arith.constant 0 : index
    %c0_19 = arith.constant 0 : index
    %18 = vector.load %arg2[%c2, %c0_18, %c0_19] : memref<3x102x128xbf16, #tpu.memory_space<vmem>>, vector<1x102x128xbf16>
    %19 = vector.shape_cast %18 : vector<1x102x128xbf16> to vector<102x128xbf16>
    %cst_20 = arith.constant dense<0.000000e+00> : vector<16x128xf32>
    %20 = tpu.matmul %17, %19, %cst_20 {dimension_numbers = #tpu.dot_dimension_numbers<[1], [0], [0], [1], [0, 0, 1, 1], [], []>} : vector<16x102xbf16>, vector<102x128xbf16>, vector<16x128xf32> -> vector<16x128xf32>
    %21 = arith.addf %14, %20 : vector<16x128xf32>
    %cst_21 = arith.constant 0.000000e+00 : f32
    %22 = vector.broadcast %cst_21 : f32 to vector<16x128xf32>
    %23 = arith.maximumf %21, %22 : vector<16x128xf32>
    %24 = arith.truncf %23 : vector<16x128xf32> to vector<16x128xbf16>
    %c0_22 = arith.constant 0 : index
    %c0_23 = arith.constant 0 : index
    %c0_24 = arith.constant 0 : index
    %25 = vector.load %arg3[%c0_22, %c0_23, %c0_24] : memref<1x16x128xbf16, #tpu.memory_space<vmem>>, vector<1x16x128xbf16>
    %26 = vector.shape_cast %25 : vector<1x16x128xbf16> to vector<16x128xbf16>
    %27 = vector.shape_cast %24 : vector<16x128xbf16> to vector<1x16x128xbf16>
    tpu.vector_store %arg3[%c0_22, %c0_23, %c0_24], %27 {strides = array<i32>} : memref<1x16x128xbf16, #tpu.memory_space<vmem>>, vector<1x16x128xbf16>,
    return
  }
  func.func @transform_0(%arg0: i32) -> (i32, i32, i32, i32) {
    %c0_i32 = arith.constant 0 : i32
    %c0_i32_0 = arith.constant 0 : i32
    %c0_i32_1 = arith.constant 0 : i32
    %c0_i32_2 = arith.constant 0 : i32
    return %arg0, %c0_i32, %c0_i32_0, %c0_i32_1 : i32, i32, i32, i32
  }
  func.func @transform_1(%arg0: i32) -> (i32, i32, i32) {
    %c0_i32 = arith.constant 0 : i32
    %c0_i32_0 = arith.constant 0 : i32
    %c0_i32_1 = arith.constant 0 : i32
    %c0_i32_2 = arith.constant 0 : i32
    return %c0_i32, %c0_i32_0, %c0_i32_1 : i32, i32, i32
  }
  func.func @transform_2(%arg0: i32) -> (i32, i32, i32) {
    %c0_i32 = arith.constant 0 : i32
    %c0_i32_0 = arith.constant 0 : i32
    %c0_i32_1 = arith.constant 0 : i32
    return %arg0, %c0_i32, %c0_i32_0 : i32, i32, i32
  }
}

module attributes {stable_mosaic.version = 11 : i64} {
  func.func @_banded_conv_kernel(%arg0: i32, %arg1: memref<1x2x9x144xbf16, #tpu.memory_space<vmem>>, %arg2: memref<3x144x128xbf16, #tpu.memory_space<vmem>>, %arg3: memref<1x8x128xbf16, #tpu.memory_space<vmem>>) attributes {dimension_semantics = [#tpu.dimension_semantics<parallel>], iteration_bounds = array<i64: 2>, scalar_prefetch = 0 : i64, scratch_operands = 0 : i64, tpu.core_type = #tpu.core_type<tc>, window_params = [{transform_indices = @transform_0, window_bounds = array<i64: 1, 2, 9, 144>}, {pipeline_mode = #tpu.pipeline_mode<synchronous>, transform_indices = @transform_1, window_bounds = array<i64: 3, 144, 128>}, {transform_indices = @transform_2, window_bounds = array<i64: 1, 8, 128>}]} {
    %cst = arith.constant 0.000000e+00 : f32
    %0 = vector.broadcast %cst : f32 to vector<8x128xf32>
    %c0 = arith.constant 0 : index
    %c0_0 = arith.constant 0 : index
    %c0_1 = arith.constant 0 : index
    %c0_2 = arith.constant 0 : index
    %1 = vector.load %arg1[%c0, %c0_0, %c0_1, %c0_2] : memref<1x2x9x144xbf16, #tpu.memory_space<vmem>>, vector<1x1x9x144xbf16>
    %2 = vector.shape_cast %1 : vector<1x1x9x144xbf16> to vector<9x144xbf16>
    %3 = vector.extract_strided_slice %2 {offsets = [0, 0], sizes = [8, 144], strides = [1, 1]} : vector<9x144xbf16> to vector<8x144xbf16>
    %c0_3 = arith.constant 0 : index
    %c0_4 = arith.constant 0 : index
    %c0_5 = arith.constant 0 : index
    %4 = vector.load %arg2[%c0_3, %c0_4, %c0_5] : memref<3x144x128xbf16, #tpu.memory_space<vmem>>, vector<1x144x128xbf16>
    %5 = vector.shape_cast %4 : vector<1x144x128xbf16> to vector<144x128xbf16>
    %cst_6 = arith.constant dense<0.000000e+00> : vector<8x128xf32>
    %6 = tpu.matmul %3, %5, %cst_6 {dimension_numbers = #tpu.dot_dimension_numbers<[1], [0], [0], [1], [0, 0, 1, 1], [], []>} : vector<8x144xbf16>, vector<144x128xbf16>, vector<8x128xf32> -> vector<8x128xf32>
    %7 = arith.addf %0, %6 : vector<8x128xf32>
    %c0_7 = arith.constant 0 : index
    %c1 = arith.constant 1 : index
    %c0_8 = arith.constant 0 : index
    %c0_9 = arith.constant 0 : index
    %8 = vector.load %arg1[%c0_7, %c1, %c0_8, %c0_9] : memref<1x2x9x144xbf16, #tpu.memory_space<vmem>>, vector<1x1x9x144xbf16>
    %9 = vector.shape_cast %8 : vector<1x1x9x144xbf16> to vector<9x144xbf16>
    %10 = vector.extract_strided_slice %9 {offsets = [0, 0], sizes = [8, 144], strides = [1, 1]} : vector<9x144xbf16> to vector<8x144xbf16>
    %c1_10 = arith.constant 1 : index
    %c0_11 = arith.constant 0 : index
    %c0_12 = arith.constant 0 : index
    %11 = vector.load %arg2[%c1_10, %c0_11, %c0_12] : memref<3x144x128xbf16, #tpu.memory_space<vmem>>, vector<1x144x128xbf16>
    %12 = vector.shape_cast %11 : vector<1x144x128xbf16> to vector<144x128xbf16>
    %cst_13 = arith.constant dense<0.000000e+00> : vector<8x128xf32>
    %13 = tpu.matmul %10, %12, %cst_13 {dimension_numbers = #tpu.dot_dimension_numbers<[1], [0], [0], [1], [0, 0, 1, 1], [], []>} : vector<8x144xbf16>, vector<144x128xbf16>, vector<8x128xf32> -> vector<8x128xf32>
    %14 = arith.addf %7, %13 : vector<8x128xf32>
    %c0_14 = arith.constant 0 : index
    %c0_15 = arith.constant 0 : index
    %c0_16 = arith.constant 0 : index
    %c0_17 = arith.constant 0 : index
    %15 = vector.load %arg1[%c0_14, %c0_15, %c0_16, %c0_17] : memref<1x2x9x144xbf16, #tpu.memory_space<vmem>>, vector<1x1x9x144xbf16>
    %16 = vector.shape_cast %15 : vector<1x1x9x144xbf16> to vector<9x144xbf16>
    %17 = vector.extract_strided_slice %16 {offsets = [1, 0], sizes = [8, 144], strides = [1, 1]} : vector<9x144xbf16> to vector<8x144xbf16>
    %c2 = arith.constant 2 : index
    %c0_18 = arith.constant 0 : index
    %c0_19 = arith.constant 0 : index
    %18 = vector.load %arg2[%c2, %c0_18, %c0_19] : memref<3x144x128xbf16, #tpu.memory_space<vmem>>, vector<1x144x128xbf16>
    %19 = vector.shape_cast %18 : vector<1x144x128xbf16> to vector<144x128xbf16>
    %cst_20 = arith.constant dense<0.000000e+00> : vector<8x128xf32>
    %20 = tpu.matmul %17, %19, %cst_20 {dimension_numbers = #tpu.dot_dimension_numbers<[1], [0], [0], [1], [0, 0, 1, 1], [], []>} : vector<8x144xbf16>, vector<144x128xbf16>, vector<8x128xf32> -> vector<8x128xf32>
    %21 = arith.addf %14, %20 : vector<8x128xf32>
    %cst_21 = arith.constant 0.000000e+00 : f32
    %22 = vector.broadcast %cst_21 : f32 to vector<8x128xf32>
    %23 = arith.maximumf %21, %22 : vector<8x128xf32>
    %24 = arith.truncf %23 : vector<8x128xf32> to vector<8x128xbf16>
    %c0_22 = arith.constant 0 : index
    %c0_23 = arith.constant 0 : index
    %c0_24 = arith.constant 0 : index
    %25 = vector.load %arg3[%c0_22, %c0_23, %c0_24] : memref<1x8x128xbf16, #tpu.memory_space<vmem>>, vector<1x8x128xbf16>
    %26 = vector.shape_cast %25 : vector<1x8x128xbf16> to vector<8x128xbf16>
    %27 = vector.shape_cast %24 : vector<8x128xbf16> to vector<1x8x128xbf16>
    tpu.vector_store %arg3[%c0_22, %c0_23, %c0_24], %27 {strides = array<i32>} : memref<1x8x128xbf16, #tpu.memory_space<vmem>>, vector<1x8x128xbf16>,
    return
  }
  func.func @transform_0(%arg0: i32) -> (i32, i32, i32, i32) {
    %c0_i32 = arith.constant 0 : i32
    %c0_i32_0 = arith.constant 0 : i32
    %c0_i32_1 = arith.constant 0 : i32
    %c0_i32_2 = arith.constant 0 : i32
    return %arg0, %c0_i32, %c0_i32_0, %c0_i32_1 : i32, i32, i32, i32
  }
  func.func @transform_1(%arg0: i32) -> (i32, i32, i32) {
    %c0_i32 = arith.constant 0 : i32
    %c0_i32_0 = arith.constant 0 : i32
    %c0_i32_1 = arith.constant 0 : i32
    %c0_i32_2 = arith.constant 0 : i32
    return %c0_i32, %c0_i32_0, %c0_i32_1 : i32, i32, i32
  }
  func.func @transform_2(%arg0: i32) -> (i32, i32, i32) {
    %c0_i32 = arith.constant 0 : i32
    %c0_i32_0 = arith.constant 0 : i32
    %c0_i32_1 = arith.constant 0 : i32
    return %arg0, %c0_i32, %c0_i32_0 : i32, i32, i32
  }
}

module attributes {stable_mosaic.version = 11 : i64} {
  func.func @_banded_conv_kernel(%arg0: i32, %arg1: memref<1x2x5x160xbf16, #tpu.memory_space<vmem>>, %arg2: memref<3x160x128xbf16, #tpu.memory_space<vmem>>, %arg3: memref<1x4x128xbf16, #tpu.memory_space<vmem>>) attributes {dimension_semantics = [#tpu.dimension_semantics<parallel>], iteration_bounds = array<i64: 2>, scalar_prefetch = 0 : i64, scratch_operands = 0 : i64, tpu.core_type = #tpu.core_type<tc>, window_params = [{transform_indices = @transform_0, window_bounds = array<i64: 1, 2, 5, 160>}, {pipeline_mode = #tpu.pipeline_mode<synchronous>, transform_indices = @transform_1, window_bounds = array<i64: 3, 160, 128>}, {transform_indices = @transform_2, window_bounds = array<i64: 1, 4, 128>}]} {
    %cst = arith.constant 0.000000e+00 : f32
    %0 = vector.broadcast %cst : f32 to vector<4x128xf32>
    %c0 = arith.constant 0 : index
    %c0_0 = arith.constant 0 : index
    %c0_1 = arith.constant 0 : index
    %c0_2 = arith.constant 0 : index
    %1 = vector.load %arg1[%c0, %c0_0, %c0_1, %c0_2] : memref<1x2x5x160xbf16, #tpu.memory_space<vmem>>, vector<1x1x5x160xbf16>
    %2 = vector.shape_cast %1 : vector<1x1x5x160xbf16> to vector<5x160xbf16>
    %3 = vector.extract_strided_slice %2 {offsets = [0, 0], sizes = [4, 160], strides = [1, 1]} : vector<5x160xbf16> to vector<4x160xbf16>
    %c0_3 = arith.constant 0 : index
    %c0_4 = arith.constant 0 : index
    %c0_5 = arith.constant 0 : index
    %4 = vector.load %arg2[%c0_3, %c0_4, %c0_5] : memref<3x160x128xbf16, #tpu.memory_space<vmem>>, vector<1x160x128xbf16>
    %5 = vector.shape_cast %4 : vector<1x160x128xbf16> to vector<160x128xbf16>
    %cst_6 = arith.constant dense<0.000000e+00> : vector<4x128xf32>
    %6 = tpu.matmul %3, %5, %cst_6 {dimension_numbers = #tpu.dot_dimension_numbers<[1], [0], [0], [1], [0, 0, 1, 1], [], []>} : vector<4x160xbf16>, vector<160x128xbf16>, vector<4x128xf32> -> vector<4x128xf32>
    %7 = arith.addf %0, %6 : vector<4x128xf32>
    %c0_7 = arith.constant 0 : index
    %c1 = arith.constant 1 : index
    %c0_8 = arith.constant 0 : index
    %c0_9 = arith.constant 0 : index
    %8 = vector.load %arg1[%c0_7, %c1, %c0_8, %c0_9] : memref<1x2x5x160xbf16, #tpu.memory_space<vmem>>, vector<1x1x5x160xbf16>
    %9 = vector.shape_cast %8 : vector<1x1x5x160xbf16> to vector<5x160xbf16>
    %10 = vector.extract_strided_slice %9 {offsets = [0, 0], sizes = [4, 160], strides = [1, 1]} : vector<5x160xbf16> to vector<4x160xbf16>
    %c1_10 = arith.constant 1 : index
    %c0_11 = arith.constant 0 : index
    %c0_12 = arith.constant 0 : index
    %11 = vector.load %arg2[%c1_10, %c0_11, %c0_12] : memref<3x160x128xbf16, #tpu.memory_space<vmem>>, vector<1x160x128xbf16>
    %12 = vector.shape_cast %11 : vector<1x160x128xbf16> to vector<160x128xbf16>
    %cst_13 = arith.constant dense<0.000000e+00> : vector<4x128xf32>
    %13 = tpu.matmul %10, %12, %cst_13 {dimension_numbers = #tpu.dot_dimension_numbers<[1], [0], [0], [1], [0, 0, 1, 1], [], []>} : vector<4x160xbf16>, vector<160x128xbf16>, vector<4x128xf32> -> vector<4x128xf32>
    %14 = arith.addf %7, %13 : vector<4x128xf32>
    %c0_14 = arith.constant 0 : index
    %c0_15 = arith.constant 0 : index
    %c0_16 = arith.constant 0 : index
    %c0_17 = arith.constant 0 : index
    %15 = vector.load %arg1[%c0_14, %c0_15, %c0_16, %c0_17] : memref<1x2x5x160xbf16, #tpu.memory_space<vmem>>, vector<1x1x5x160xbf16>
    %16 = vector.shape_cast %15 : vector<1x1x5x160xbf16> to vector<5x160xbf16>
    %17 = vector.extract_strided_slice %16 {offsets = [1, 0], sizes = [4, 160], strides = [1, 1]} : vector<5x160xbf16> to vector<4x160xbf16>
    %c2 = arith.constant 2 : index
    %c0_18 = arith.constant 0 : index
    %c0_19 = arith.constant 0 : index
    %18 = vector.load %arg2[%c2, %c0_18, %c0_19] : memref<3x160x128xbf16, #tpu.memory_space<vmem>>, vector<1x160x128xbf16>
    %19 = vector.shape_cast %18 : vector<1x160x128xbf16> to vector<160x128xbf16>
    %cst_20 = arith.constant dense<0.000000e+00> : vector<4x128xf32>
    %20 = tpu.matmul %17, %19, %cst_20 {dimension_numbers = #tpu.dot_dimension_numbers<[1], [0], [0], [1], [0, 0, 1, 1], [], []>} : vector<4x160xbf16>, vector<160x128xbf16>, vector<4x128xf32> -> vector<4x128xf32>
    %21 = arith.addf %14, %20 : vector<4x128xf32>
    %cst_21 = arith.constant 0.000000e+00 : f32
    %22 = vector.broadcast %cst_21 : f32 to vector<4x128xf32>
    %23 = arith.maximumf %21, %22 : vector<4x128xf32>
    %24 = arith.truncf %23 : vector<4x128xf32> to vector<4x128xbf16>
    %c0_22 = arith.constant 0 : index
    %c0_23 = arith.constant 0 : index
    %c0_24 = arith.constant 0 : index
    %25 = vector.load %arg3[%c0_22, %c0_23, %c0_24] : memref<1x4x128xbf16, #tpu.memory_space<vmem>>, vector<1x4x128xbf16>
    %26 = vector.shape_cast %25 : vector<1x4x128xbf16> to vector<4x128xbf16>
    %27 = vector.shape_cast %24 : vector<4x128xbf16> to vector<1x4x128xbf16>
    tpu.vector_store %arg3[%c0_22, %c0_23, %c0_24], %27 {strides = array<i32>} : memref<1x4x128xbf16, #tpu.memory_space<vmem>>, vector<1x4x128xbf16>,
    return
  }
  func.func @transform_0(%arg0: i32) -> (i32, i32, i32, i32) {
    %c0_i32 = arith.constant 0 : i32
    %c0_i32_0 = arith.constant 0 : i32
    %c0_i32_1 = arith.constant 0 : i32
    %c0_i32_2 = arith.constant 0 : i32
    return %arg0, %c0_i32, %c0_i32_0, %c0_i32_1 : i32, i32, i32, i32
  }
  func.func @transform_1(%arg0: i32) -> (i32, i32, i32) {
    %c0_i32 = arith.constant 0 : i32
    %c0_i32_0 = arith.constant 0 : i32
    %c0_i32_1 = arith.constant 0 : i32
    %c0_i32_2 = arith.constant 0 : i32
    return %c0_i32, %c0_i32_0, %c0_i32_1 : i32, i32, i32
  }
  func.func @transform_2(%arg0: i32) -> (i32, i32, i32) {
    %c0_i32 = arith.constant 0 : i32
    %c0_i32_0 = arith.constant 0 : i32
    %c0_i32_1 = arith.constant 0 : i32
    return %arg0, %c0_i32, %c0_i32_0 : i32, i32, i32
  }
}

module attributes {stable_mosaic.version = 11 : i64} {
  func.func @_banded_conv_kernel(%arg0: i32, %arg1: memref<1x1x4x128xbf16, #tpu.memory_space<vmem>>, %arg2: memref<1x128x64xbf16, #tpu.memory_space<vmem>>, %arg3: memref<1x4x64xbf16, #tpu.memory_space<vmem>>) attributes {dimension_semantics = [#tpu.dimension_semantics<parallel>], iteration_bounds = array<i64: 2>, scalar_prefetch = 0 : i64, scratch_operands = 0 : i64, tpu.core_type = #tpu.core_type<tc>, window_params = [{transform_indices = @transform_0, window_bounds = array<i64: 1, 1, 4, 128>}, {pipeline_mode = #tpu.pipeline_mode<synchronous>, transform_indices = @transform_1, window_bounds = array<i64: 1, 128, 64>}, {transform_indices = @transform_2, window_bounds = array<i64: 1, 4, 64>}]} {
    %cst = arith.constant 0.000000e+00 : f32
    %0 = vector.broadcast %cst : f32 to vector<4x64xf32>
    %c0 = arith.constant 0 : index
    %c0_0 = arith.constant 0 : index
    %c0_1 = arith.constant 0 : index
    %c0_2 = arith.constant 0 : index
    %1 = vector.load %arg1[%c0, %c0_0, %c0_1, %c0_2] : memref<1x1x4x128xbf16, #tpu.memory_space<vmem>>, vector<1x1x4x128xbf16>
    %2 = vector.shape_cast %1 : vector<1x1x4x128xbf16> to vector<4x128xbf16>
    %c0_3 = arith.constant 0 : index
    %c0_4 = arith.constant 0 : index
    %c0_5 = arith.constant 0 : index
    %3 = vector.load %arg2[%c0_3, %c0_4, %c0_5] : memref<1x128x64xbf16, #tpu.memory_space<vmem>>, vector<1x128x64xbf16>
    %4 = vector.shape_cast %3 : vector<1x128x64xbf16> to vector<128x64xbf16>
    %cst_6 = arith.constant dense<0.000000e+00> : vector<4x64xf32>
    %5 = tpu.matmul %2, %4, %cst_6 {dimension_numbers = #tpu.dot_dimension_numbers<[1], [0], [0], [1], [0, 0, 1, 1], [], []>} : vector<4x128xbf16>, vector<128x64xbf16>, vector<4x64xf32> -> vector<4x64xf32>
    %6 = arith.addf %0, %5 : vector<4x64xf32>
    %7 = arith.truncf %6 : vector<4x64xf32> to vector<4x64xbf16>
    %c0_7 = arith.constant 0 : index
    %c0_8 = arith.constant 0 : index
    %c0_9 = arith.constant 0 : index
    %8 = vector.load %arg3[%c0_7, %c0_8, %c0_9] : memref<1x4x64xbf16, #tpu.memory_space<vmem>>, vector<1x4x64xbf16>
    %9 = vector.shape_cast %8 : vector<1x4x64xbf16> to vector<4x64xbf16>
    %10 = vector.shape_cast %7 : vector<4x64xbf16> to vector<1x4x64xbf16>
    tpu.vector_store %arg3[%c0_7, %c0_8, %c0_9], %10 {strides = array<i32>} : memref<1x4x64xbf16, #tpu.memory_space<vmem>>, vector<1x4x64xbf16>,
    return
  }
  func.func @transform_0(%arg0: i32) -> (i32, i32, i32, i32) {
    %c0_i32 = arith.constant 0 : i32
    %c0_i32_0 = arith.constant 0 : i32
    %c0_i32_1 = arith.constant 0 : i32
    %c0_i32_2 = arith.constant 0 : i32
    return %arg0, %c0_i32, %c0_i32_0, %c0_i32_1 : i32, i32, i32, i32
  }
  func.func @transform_1(%arg0: i32) -> (i32, i32, i32) {
    %c0_i32 = arith.constant 0 : i32
    %c0_i32_0 = arith.constant 0 : i32
    %c0_i32_1 = arith.constant 0 : i32
    %c0_i32_2 = arith.constant 0 : i32
    return %c0_i32, %c0_i32_0, %c0_i32_1 : i32, i32, i32
  }
  func.func @transform_2(%arg0: i32) -> (i32, i32, i32) {
    %c0_i32 = arith.constant 0 : i32
    %c0_i32_0 = arith.constant 0 : i32
    %c0_i32_1 = arith.constant 0 : i32
    return %arg0, %c0_i32, %c0_i32_0 : i32, i32, i32
  }
}

module attributes {stable_mosaic.version = 11 : i64} {
  func.func @_banded_conv_kernel(%arg0: i32, %arg1: memref<1x1x8x128xbf16, #tpu.memory_space<vmem>>, %arg2: memref<1x8x128xbf16, #tpu.memory_space<vmem>>, %arg3: memref<1x128x128xbf16, #tpu.memory_space<vmem>>, %arg4: memref<1x8x128xbf16, #tpu.memory_space<vmem>>) attributes {dimension_semantics = [#tpu.dimension_semantics<parallel>], iteration_bounds = array<i64: 2>, scalar_prefetch = 0 : i64, scratch_operands = 0 : i64, tpu.core_type = #tpu.core_type<tc>, window_params = [{transform_indices = @transform_0, window_bounds = array<i64: 1, 1, 8, 128>}, {transform_indices = @transform_1, window_bounds = array<i64: 1, 8, 128>}, {pipeline_mode = #tpu.pipeline_mode<synchronous>, transform_indices = @transform_2, window_bounds = array<i64: 1, 128, 128>}, {transform_indices = @transform_3, window_bounds = array<i64: 1, 8, 128>}]} {
    %cst = arith.constant 0.000000e+00 : f32
    %0 = vector.broadcast %cst : f32 to vector<8x128xf32>
    %c0 = arith.constant 0 : index
    %c0_0 = arith.constant 0 : index
    %c0_1 = arith.constant 0 : index
    %c0_2 = arith.constant 0 : index
    %1 = vector.load %arg1[%c0, %c0_0, %c0_1, %c0_2] : memref<1x1x8x128xbf16, #tpu.memory_space<vmem>>, vector<1x1x8x128xbf16>
    %2 = vector.shape_cast %1 : vector<1x1x8x128xbf16> to vector<8x128xbf16>
    %c0_3 = arith.constant 0 : index
    %c0_4 = arith.constant 0 : index
    %c0_5 = arith.constant 0 : index
    %3 = vector.load %arg3[%c0_3, %c0_4, %c0_5] : memref<1x128x128xbf16, #tpu.memory_space<vmem>>, vector<1x128x128xbf16>
    %4 = vector.shape_cast %3 : vector<1x128x128xbf16> to vector<128x128xbf16>
    %cst_6 = arith.constant dense<0.000000e+00> : vector<8x128xf32>
    %5 = tpu.matmul %2, %4, %cst_6 {dimension_numbers = #tpu.dot_dimension_numbers<[1], [0], [0], [1], [0, 0, 1, 1], [], []>} : vector<8x128xbf16>, vector<128x128xbf16>, vector<8x128xf32> -> vector<8x128xf32>
    %6 = arith.addf %0, %5 : vector<8x128xf32>
    %c0_7 = arith.constant 0 : index
    %c0_8 = arith.constant 0 : index
    %c0_9 = arith.constant 0 : index
    %7 = vector.load %arg2[%c0_7, %c0_8, %c0_9] : memref<1x8x128xbf16, #tpu.memory_space<vmem>>, vector<1x8x128xbf16>
    %8 = vector.shape_cast %7 : vector<1x8x128xbf16> to vector<8x128xbf16>
    %9 = arith.extf %8 : vector<8x128xbf16> to vector<8x128xf32>
    %10 = arith.addf %6, %9 : vector<8x128xf32>
    %11 = arith.truncf %10 : vector<8x128xf32> to vector<8x128xbf16>
    %c0_10 = arith.constant 0 : index
    %c0_11 = arith.constant 0 : index
    %c0_12 = arith.constant 0 : index
    %12 = vector.load %arg4[%c0_10, %c0_11, %c0_12] : memref<1x8x128xbf16, #tpu.memory_space<vmem>>, vector<1x8x128xbf16>
    %13 = vector.shape_cast %12 : vector<1x8x128xbf16> to vector<8x128xbf16>
    %14 = vector.shape_cast %11 : vector<8x128xbf16> to vector<1x8x128xbf16>
    tpu.vector_store %arg4[%c0_10, %c0_11, %c0_12], %14 {strides = array<i32>} : memref<1x8x128xbf16, #tpu.memory_space<vmem>>, vector<1x8x128xbf16>,
    return
  }
  func.func @transform_0(%arg0: i32) -> (i32, i32, i32, i32) {
    %c0_i32 = arith.constant 0 : i32
    %c0_i32_0 = arith.constant 0 : i32
    %c0_i32_1 = arith.constant 0 : i32
    %c0_i32_2 = arith.constant 0 : i32
    return %arg0, %c0_i32, %c0_i32_0, %c0_i32_1 : i32, i32, i32, i32
  }
  func.func @transform_1(%arg0: i32) -> (i32, i32, i32) {
    %c0_i32 = arith.constant 0 : i32
    %c0_i32_0 = arith.constant 0 : i32
    %c0_i32_1 = arith.constant 0 : i32
    return %arg0, %c0_i32, %c0_i32_0 : i32, i32, i32
  }
  func.func @transform_2(%arg0: i32) -> (i32, i32, i32) {
    %c0_i32 = arith.constant 0 : i32
    %c0_i32_0 = arith.constant 0 : i32
    %c0_i32_1 = arith.constant 0 : i32
    %c0_i32_2 = arith.constant 0 : i32
    return %c0_i32, %c0_i32_0, %c0_i32_1 : i32, i32, i32
  }
  func.func @transform_3(%arg0: i32) -> (i32, i32, i32) {
    %c0_i32 = arith.constant 0 : i32
    %c0_i32_0 = arith.constant 0 : i32
    %c0_i32_1 = arith.constant 0 : i32
    return %arg0, %c0_i32, %c0_i32_0 : i32, i32, i32
  }
}

module attributes {stable_mosaic.version = 11 : i64} {
  func.func @_banded_conv_kernel(%arg0: i32, %arg1: memref<1x1x16x128xbf16, #tpu.memory_space<vmem>>, %arg2: memref<1x16x256xbf16, #tpu.memory_space<vmem>>, %arg3: memref<1x128x256xbf16, #tpu.memory_space<vmem>>, %arg4: memref<1x16x256xbf16, #tpu.memory_space<vmem>>) attributes {dimension_semantics = [#tpu.dimension_semantics<parallel>], iteration_bounds = array<i64: 2>, scalar_prefetch = 0 : i64, scratch_operands = 0 : i64, tpu.core_type = #tpu.core_type<tc>, window_params = [{transform_indices = @transform_0, window_bounds = array<i64: 1, 1, 16, 128>}, {transform_indices = @transform_1, window_bounds = array<i64: 1, 16, 256>}, {pipeline_mode = #tpu.pipeline_mode<synchronous>, transform_indices = @transform_2, window_bounds = array<i64: 1, 128, 256>}, {transform_indices = @transform_3, window_bounds = array<i64: 1, 16, 256>}]} {
    %cst = arith.constant 0.000000e+00 : f32
    %0 = vector.broadcast %cst : f32 to vector<16x256xf32>
    %c0 = arith.constant 0 : index
    %c0_0 = arith.constant 0 : index
    %c0_1 = arith.constant 0 : index
    %c0_2 = arith.constant 0 : index
    %1 = vector.load %arg1[%c0, %c0_0, %c0_1, %c0_2] : memref<1x1x16x128xbf16, #tpu.memory_space<vmem>>, vector<1x1x16x128xbf16>
    %2 = vector.shape_cast %1 : vector<1x1x16x128xbf16> to vector<16x128xbf16>
    %c0_3 = arith.constant 0 : index
    %c0_4 = arith.constant 0 : index
    %c0_5 = arith.constant 0 : index
    %3 = vector.load %arg3[%c0_3, %c0_4, %c0_5] : memref<1x128x256xbf16, #tpu.memory_space<vmem>>, vector<1x128x256xbf16>
    %4 = vector.shape_cast %3 : vector<1x128x256xbf16> to vector<128x256xbf16>
    %cst_6 = arith.constant dense<0.000000e+00> : vector<16x256xf32>
    %5 = tpu.matmul %2, %4, %cst_6 {dimension_numbers = #tpu.dot_dimension_numbers<[1], [0], [0], [1], [0, 0, 1, 1], [], []>} : vector<16x128xbf16>, vector<128x256xbf16>, vector<16x256xf32> -> vector<16x256xf32>
    %6 = arith.addf %0, %5 : vector<16x256xf32>
    %c0_7 = arith.constant 0 : index
    %c0_8 = arith.constant 0 : index
    %c0_9 = arith.constant 0 : index
    %7 = vector.load %arg2[%c0_7, %c0_8, %c0_9] : memref<1x16x256xbf16, #tpu.memory_space<vmem>>, vector<1x16x256xbf16>
    %8 = vector.shape_cast %7 : vector<1x16x256xbf16> to vector<16x256xbf16>
    %9 = arith.extf %8 : vector<16x256xbf16> to vector<16x256xf32>
    %10 = arith.addf %6, %9 : vector<16x256xf32>
    %11 = arith.truncf %10 : vector<16x256xf32> to vector<16x256xbf16>
    %c0_10 = arith.constant 0 : index
    %c0_11 = arith.constant 0 : index
    %c0_12 = arith.constant 0 : index
    %12 = vector.load %arg4[%c0_10, %c0_11, %c0_12] : memref<1x16x256xbf16, #tpu.memory_space<vmem>>, vector<1x16x256xbf16>
    %13 = vector.shape_cast %12 : vector<1x16x256xbf16> to vector<16x256xbf16>
    %14 = vector.shape_cast %11 : vector<16x256xbf16> to vector<1x16x256xbf16>
    tpu.vector_store %arg4[%c0_10, %c0_11, %c0_12], %14 {strides = array<i32>} : memref<1x16x256xbf16, #tpu.memory_space<vmem>>, vector<1x16x256xbf16>,
    return
  }
  func.func @transform_0(%arg0: i32) -> (i32, i32, i32, i32) {
    %c0_i32 = arith.constant 0 : i32
    %c0_i32_0 = arith.constant 0 : i32
    %c0_i32_1 = arith.constant 0 : i32
    %c0_i32_2 = arith.constant 0 : i32
    return %arg0, %c0_i32, %c0_i32_0, %c0_i32_1 : i32, i32, i32, i32
  }
  func.func @transform_1(%arg0: i32) -> (i32, i32, i32) {
    %c0_i32 = arith.constant 0 : i32
    %c0_i32_0 = arith.constant 0 : i32
    %c0_i32_1 = arith.constant 0 : i32
    return %arg0, %c0_i32, %c0_i32_0 : i32, i32, i32
  }
  func.func @transform_2(%arg0: i32) -> (i32, i32, i32) {
    %c0_i32 = arith.constant 0 : i32
    %c0_i32_0 = arith.constant 0 : i32
    %c0_i32_1 = arith.constant 0 : i32
    %c0_i32_2 = arith.constant 0 : i32
    return %c0_i32, %c0_i32_0, %c0_i32_1 : i32, i32, i32
  }
  func.func @transform_3(%arg0: i32) -> (i32, i32, i32) {
    %c0_i32 = arith.constant 0 : i32
    %c0_i32_0 = arith.constant 0 : i32
    %c0_i32_1 = arith.constant 0 : i32
    return %arg0, %c0_i32, %c0_i32_0 : i32, i32, i32
  }
}

module attributes {stable_mosaic.version = 11 : i64} {
  func.func @_banded_conv_kernel(%arg0: i32, %arg1: memref<1x1x18x288xbf16, #tpu.memory_space<vmem>>, %arg2: memref<3x288x256xbf16, #tpu.memory_space<vmem>>, %arg3: memref<1x16x256xbf16, #tpu.memory_space<vmem>>) attributes {dimension_semantics = [#tpu.dimension_semantics<parallel>], iteration_bounds = array<i64: 2>, scalar_prefetch = 0 : i64, scratch_operands = 0 : i64, tpu.core_type = #tpu.core_type<tc>, window_params = [{transform_indices = @transform_0, window_bounds = array<i64: 1, 1, 18, 288>}, {pipeline_mode = #tpu.pipeline_mode<synchronous>, transform_indices = @transform_1, window_bounds = array<i64: 3, 288, 256>}, {transform_indices = @transform_2, window_bounds = array<i64: 1, 16, 256>}]} {
    %cst = arith.constant 0.000000e+00 : f32
    %0 = vector.broadcast %cst : f32 to vector<16x256xf32>
    %c0 = arith.constant 0 : index
    %c0_0 = arith.constant 0 : index
    %c0_1 = arith.constant 0 : index
    %c0_2 = arith.constant 0 : index
    %1 = vector.load %arg1[%c0, %c0_0, %c0_1, %c0_2] : memref<1x1x18x288xbf16, #tpu.memory_space<vmem>>, vector<1x1x18x288xbf16>
    %2 = vector.shape_cast %1 : vector<1x1x18x288xbf16> to vector<18x288xbf16>
    %3 = vector.extract_strided_slice %2 {offsets = [0, 0], sizes = [16, 288], strides = [1, 1]} : vector<18x288xbf16> to vector<16x288xbf16>
    %c0_3 = arith.constant 0 : index
    %c0_4 = arith.constant 0 : index
    %c0_5 = arith.constant 0 : index
    %4 = vector.load %arg2[%c0_3, %c0_4, %c0_5] : memref<3x288x256xbf16, #tpu.memory_space<vmem>>, vector<1x288x256xbf16>
    %5 = vector.shape_cast %4 : vector<1x288x256xbf16> to vector<288x256xbf16>
    %cst_6 = arith.constant dense<0.000000e+00> : vector<16x256xf32>
    %6 = tpu.matmul %3, %5, %cst_6 {dimension_numbers = #tpu.dot_dimension_numbers<[1], [0], [0], [1], [0, 0, 1, 1], [], []>} : vector<16x288xbf16>, vector<288x256xbf16>, vector<16x256xf32> -> vector<16x256xf32>
    %7 = arith.addf %0, %6 : vector<16x256xf32>
    %c0_7 = arith.constant 0 : index
    %c0_8 = arith.constant 0 : index
    %c0_9 = arith.constant 0 : index
    %c0_10 = arith.constant 0 : index
    %8 = vector.load %arg1[%c0_7, %c0_8, %c0_9, %c0_10] : memref<1x1x18x288xbf16, #tpu.memory_space<vmem>>, vector<1x1x18x288xbf16>
    %9 = vector.shape_cast %8 : vector<1x1x18x288xbf16> to vector<18x288xbf16>
    %10 = vector.extract_strided_slice %9 {offsets = [1, 0], sizes = [16, 288], strides = [1, 1]} : vector<18x288xbf16> to vector<16x288xbf16>
    %c1 = arith.constant 1 : index
    %c0_11 = arith.constant 0 : index
    %c0_12 = arith.constant 0 : index
    %11 = vector.load %arg2[%c1, %c0_11, %c0_12] : memref<3x288x256xbf16, #tpu.memory_space<vmem>>, vector<1x288x256xbf16>
    %12 = vector.shape_cast %11 : vector<1x288x256xbf16> to vector<288x256xbf16>
    %cst_13 = arith.constant dense<0.000000e+00> : vector<16x256xf32>
    %13 = tpu.matmul %10, %12, %cst_13 {dimension_numbers = #tpu.dot_dimension_numbers<[1], [0], [0], [1], [0, 0, 1, 1], [], []>} : vector<16x288xbf16>, vector<288x256xbf16>, vector<16x256xf32> -> vector<16x256xf32>
    %14 = arith.addf %7, %13 : vector<16x256xf32>
    %c0_14 = arith.constant 0 : index
    %c0_15 = arith.constant 0 : index
    %c0_16 = arith.constant 0 : index
    %c0_17 = arith.constant 0 : index
    %15 = vector.load %arg1[%c0_14, %c0_15, %c0_16, %c0_17] : memref<1x1x18x288xbf16, #tpu.memory_space<vmem>>, vector<1x1x18x288xbf16>
    %16 = vector.shape_cast %15 : vector<1x1x18x288xbf16> to vector<18x288xbf16>
    %17 = vector.extract_strided_slice %16 {offsets = [2, 0], sizes = [16, 288], strides = [1, 1]} : vector<18x288xbf16> to vector<16x288xbf16>
    %c2 = arith.constant 2 : index
    %c0_18 = arith.constant 0 : index
    %c0_19 = arith.constant 0 : index
    %18 = vector.load %arg2[%c2, %c0_18, %c0_19] : memref<3x288x256xbf16, #tpu.memory_space<vmem>>, vector<1x288x256xbf16>
    %19 = vector.shape_cast %18 : vector<1x288x256xbf16> to vector<288x256xbf16>
    %cst_20 = arith.constant dense<0.000000e+00> : vector<16x256xf32>
    %20 = tpu.matmul %17, %19, %cst_20 {dimension_numbers = #tpu.dot_dimension_numbers<[1], [0], [0], [1], [0, 0, 1, 1], [], []>} : vector<16x288xbf16>, vector<288x256xbf16>, vector<16x256xf32> -> vector<16x256xf32>
    %21 = arith.addf %14, %20 : vector<16x256xf32>
    %22 = arith.truncf %21 : vector<16x256xf32> to vector<16x256xbf16>
    %c0_21 = arith.constant 0 : index
    %c0_22 = arith.constant 0 : index
    %c0_23 = arith.constant 0 : index
    %23 = vector.load %arg3[%c0_21, %c0_22, %c0_23] : memref<1x16x256xbf16, #tpu.memory_space<vmem>>, vector<1x16x256xbf16>
    %24 = vector.shape_cast %23 : vector<1x16x256xbf16> to vector<16x256xbf16>
    %25 = vector.shape_cast %22 : vector<16x256xbf16> to vector<1x16x256xbf16>
    tpu.vector_store %arg3[%c0_21, %c0_22, %c0_23], %25 {strides = array<i32>} : memref<1x16x256xbf16, #tpu.memory_space<vmem>>, vector<1x16x256xbf16>,
    return
  }
  func.func @transform_0(%arg0: i32) -> (i32, i32, i32, i32) {
    %c0_i32 = arith.constant 0 : i32
    %c0_i32_0 = arith.constant 0 : i32
    %c0_i32_1 = arith.constant 0 : i32
    %c0_i32_2 = arith.constant 0 : i32
    return %arg0, %c0_i32, %c0_i32_0, %c0_i32_1 : i32, i32, i32, i32
  }
  func.func @transform_1(%arg0: i32) -> (i32, i32, i32) {
    %c0_i32 = arith.constant 0 : i32
    %c0_i32_0 = arith.constant 0 : i32
    %c0_i32_1 = arith.constant 0 : i32
    %c0_i32_2 = arith.constant 0 : i32
    return %c0_i32, %c0_i32_0, %c0_i32_1 : i32, i32, i32
  }
  func.func @transform_2(%arg0: i32) -> (i32, i32, i32) {
    %c0_i32 = arith.constant 0 : i32
    %c0_i32_0 = arith.constant 0 : i32
    %c0_i32_1 = arith.constant 0 : i32
    return %arg0, %c0_i32, %c0_i32_0 : i32, i32, i32
  }
}

module attributes {stable_mosaic.version = 11 : i64} {
  func.func @_banded_conv_kernel(%arg0: i32, %arg1: memref<1x1x10x160xbf16, #tpu.memory_space<vmem>>, %arg2: memref<3x160x128xbf16, #tpu.memory_space<vmem>>, %arg3: memref<1x8x128xbf16, #tpu.memory_space<vmem>>) attributes {dimension_semantics = [#tpu.dimension_semantics<parallel>], iteration_bounds = array<i64: 2>, scalar_prefetch = 0 : i64, scratch_operands = 0 : i64, tpu.core_type = #tpu.core_type<tc>, window_params = [{transform_indices = @transform_0, window_bounds = array<i64: 1, 1, 10, 160>}, {pipeline_mode = #tpu.pipeline_mode<synchronous>, transform_indices = @transform_1, window_bounds = array<i64: 3, 160, 128>}, {transform_indices = @transform_2, window_bounds = array<i64: 1, 8, 128>}]} {
    %cst = arith.constant 0.000000e+00 : f32
    %0 = vector.broadcast %cst : f32 to vector<8x128xf32>
    %c0 = arith.constant 0 : index
    %c0_0 = arith.constant 0 : index
    %c0_1 = arith.constant 0 : index
    %c0_2 = arith.constant 0 : index
    %1 = vector.load %arg1[%c0, %c0_0, %c0_1, %c0_2] : memref<1x1x10x160xbf16, #tpu.memory_space<vmem>>, vector<1x1x10x160xbf16>
    %2 = vector.shape_cast %1 : vector<1x1x10x160xbf16> to vector<10x160xbf16>
    %3 = vector.extract_strided_slice %2 {offsets = [0, 0], sizes = [8, 160], strides = [1, 1]} : vector<10x160xbf16> to vector<8x160xbf16>
    %c0_3 = arith.constant 0 : index
    %c0_4 = arith.constant 0 : index
    %c0_5 = arith.constant 0 : index
    %4 = vector.load %arg2[%c0_3, %c0_4, %c0_5] : memref<3x160x128xbf16, #tpu.memory_space<vmem>>, vector<1x160x128xbf16>
    %5 = vector.shape_cast %4 : vector<1x160x128xbf16> to vector<160x128xbf16>
    %cst_6 = arith.constant dense<0.000000e+00> : vector<8x128xf32>
    %6 = tpu.matmul %3, %5, %cst_6 {dimension_numbers = #tpu.dot_dimension_numbers<[1], [0], [0], [1], [0, 0, 1, 1], [], []>} : vector<8x160xbf16>, vector<160x128xbf16>, vector<8x128xf32> -> vector<8x128xf32>
    %7 = arith.addf %0, %6 : vector<8x128xf32>
    %c0_7 = arith.constant 0 : index
    %c0_8 = arith.constant 0 : index
    %c0_9 = arith.constant 0 : index
    %c0_10 = arith.constant 0 : index
    %8 = vector.load %arg1[%c0_7, %c0_8, %c0_9, %c0_10] : memref<1x1x10x160xbf16, #tpu.memory_space<vmem>>, vector<1x1x10x160xbf16>
    %9 = vector.shape_cast %8 : vector<1x1x10x160xbf16> to vector<10x160xbf16>
    %10 = vector.extract_strided_slice %9 {offsets = [1, 0], sizes = [8, 160], strides = [1, 1]} : vector<10x160xbf16> to vector<8x160xbf16>
    %c1 = arith.constant 1 : index
    %c0_11 = arith.constant 0 : index
    %c0_12 = arith.constant 0 : index
    %11 = vector.load %arg2[%c1, %c0_11, %c0_12] : memref<3x160x128xbf16, #tpu.memory_space<vmem>>, vector<1x160x128xbf16>
    %12 = vector.shape_cast %11 : vector<1x160x128xbf16> to vector<160x128xbf16>
    %cst_13 = arith.constant dense<0.000000e+00> : vector<8x128xf32>
    %13 = tpu.matmul %10, %12, %cst_13 {dimension_numbers = #tpu.dot_dimension_numbers<[1], [0], [0], [1], [0, 0, 1, 1], [], []>} : vector<8x160xbf16>, vector<160x128xbf16>, vector<8x128xf32> -> vector<8x128xf32>
    %14 = arith.addf %7, %13 : vector<8x128xf32>
    %c0_14 = arith.constant 0 : index
    %c0_15 = arith.constant 0 : index
    %c0_16 = arith.constant 0 : index
    %c0_17 = arith.constant 0 : index
    %15 = vector.load %arg1[%c0_14, %c0_15, %c0_16, %c0_17] : memref<1x1x10x160xbf16, #tpu.memory_space<vmem>>, vector<1x1x10x160xbf16>
    %16 = vector.shape_cast %15 : vector<1x1x10x160xbf16> to vector<10x160xbf16>
    %17 = vector.extract_strided_slice %16 {offsets = [2, 0], sizes = [8, 160], strides = [1, 1]} : vector<10x160xbf16> to vector<8x160xbf16>
    %c2 = arith.constant 2 : index
    %c0_18 = arith.constant 0 : index
    %c0_19 = arith.constant 0 : index
    %18 = vector.load %arg2[%c2, %c0_18, %c0_19] : memref<3x160x128xbf16, #tpu.memory_space<vmem>>, vector<1x160x128xbf16>
    %19 = vector.shape_cast %18 : vector<1x160x128xbf16> to vector<160x128xbf16>
    %cst_20 = arith.constant dense<0.000000e+00> : vector<8x128xf32>
    %20 = tpu.matmul %17, %19, %cst_20 {dimension_numbers = #tpu.dot_dimension_numbers<[1], [0], [0], [1], [0, 0, 1, 1], [], []>} : vector<8x160xbf16>, vector<160x128xbf16>, vector<8x128xf32> -> vector<8x128xf32>
    %21 = arith.addf %14, %20 : vector<8x128xf32>
    %22 = arith.truncf %21 : vector<8x128xf32> to vector<8x128xbf16>
    %c0_21 = arith.constant 0 : index
    %c0_22 = arith.constant 0 : index
    %c0_23 = arith.constant 0 : index
    %23 = vector.load %arg3[%c0_21, %c0_22, %c0_23] : memref<1x8x128xbf16, #tpu.memory_space<vmem>>, vector<1x8x128xbf16>
    %24 = vector.shape_cast %23 : vector<1x8x128xbf16> to vector<8x128xbf16>
    %25 = vector.shape_cast %22 : vector<8x128xbf16> to vector<1x8x128xbf16>
    tpu.vector_store %arg3[%c0_21, %c0_22, %c0_23], %25 {strides = array<i32>} : memref<1x8x128xbf16, #tpu.memory_space<vmem>>, vector<1x8x128xbf16>,
    return
  }
  func.func @transform_0(%arg0: i32) -> (i32, i32, i32, i32) {
    %c0_i32 = arith.constant 0 : i32
    %c0_i32_0 = arith.constant 0 : i32
    %c0_i32_1 = arith.constant 0 : i32
    %c0_i32_2 = arith.constant 0 : i32
    return %arg0, %c0_i32, %c0_i32_0, %c0_i32_1 : i32, i32, i32, i32
  }
  func.func @transform_1(%arg0: i32) -> (i32, i32, i32) {
    %c0_i32 = arith.constant 0 : i32
    %c0_i32_0 = arith.constant 0 : i32
    %c0_i32_1 = arith.constant 0 : i32
    %c0_i32_2 = arith.constant 0 : i32
    return %c0_i32, %c0_i32_0, %c0_i32_1 : i32, i32, i32
  }
  func.func @transform_2(%arg0: i32) -> (i32, i32, i32) {
    %c0_i32 = arith.constant 0 : i32
    %c0_i32_0 = arith.constant 0 : i32
    %c0_i32_1 = arith.constant 0 : i32
    return %arg0, %c0_i32, %c0_i32_0 : i32, i32, i32
  }
}

module attributes {stable_mosaic.version = 11 : i64} {
  func.func @_banded_conv_kernel(%arg0: i32, %arg1: memref<1x1x6x96xbf16, #tpu.memory_space<vmem>>, %arg2: memref<3x96x64xbf16, #tpu.memory_space<vmem>>, %arg3: memref<1x4x64xbf16, #tpu.memory_space<vmem>>) attributes {dimension_semantics = [#tpu.dimension_semantics<parallel>], iteration_bounds = array<i64: 2>, scalar_prefetch = 0 : i64, scratch_operands = 0 : i64, tpu.core_type = #tpu.core_type<tc>, window_params = [{transform_indices = @transform_0, window_bounds = array<i64: 1, 1, 6, 96>}, {pipeline_mode = #tpu.pipeline_mode<synchronous>, transform_indices = @transform_1, window_bounds = array<i64: 3, 96, 64>}, {transform_indices = @transform_2, window_bounds = array<i64: 1, 4, 64>}]} {
    %cst = arith.constant 0.000000e+00 : f32
    %0 = vector.broadcast %cst : f32 to vector<4x64xf32>
    %c0 = arith.constant 0 : index
    %c0_0 = arith.constant 0 : index
    %c0_1 = arith.constant 0 : index
    %c0_2 = arith.constant 0 : index
    %1 = vector.load %arg1[%c0, %c0_0, %c0_1, %c0_2] : memref<1x1x6x96xbf16, #tpu.memory_space<vmem>>, vector<1x1x6x96xbf16>
    %2 = vector.shape_cast %1 : vector<1x1x6x96xbf16> to vector<6x96xbf16>
    %3 = vector.extract_strided_slice %2 {offsets = [0, 0], sizes = [4, 96], strides = [1, 1]} : vector<6x96xbf16> to vector<4x96xbf16>
    %c0_3 = arith.constant 0 : index
    %c0_4 = arith.constant 0 : index
    %c0_5 = arith.constant 0 : index
    %4 = vector.load %arg2[%c0_3, %c0_4, %c0_5] : memref<3x96x64xbf16, #tpu.memory_space<vmem>>, vector<1x96x64xbf16>
    %5 = vector.shape_cast %4 : vector<1x96x64xbf16> to vector<96x64xbf16>
    %cst_6 = arith.constant dense<0.000000e+00> : vector<4x64xf32>
    %6 = tpu.matmul %3, %5, %cst_6 {dimension_numbers = #tpu.dot_dimension_numbers<[1], [0], [0], [1], [0, 0, 1, 1], [], []>} : vector<4x96xbf16>, vector<96x64xbf16>, vector<4x64xf32> -> vector<4x64xf32>
    %7 = arith.addf %0, %6 : vector<4x64xf32>
    %c0_7 = arith.constant 0 : index
    %c0_8 = arith.constant 0 : index
    %c0_9 = arith.constant 0 : index
    %c0_10 = arith.constant 0 : index
    %8 = vector.load %arg1[%c0_7, %c0_8, %c0_9, %c0_10] : memref<1x1x6x96xbf16, #tpu.memory_space<vmem>>, vector<1x1x6x96xbf16>
    %9 = vector.shape_cast %8 : vector<1x1x6x96xbf16> to vector<6x96xbf16>
    %10 = vector.extract_strided_slice %9 {offsets = [1, 0], sizes = [4, 96], strides = [1, 1]} : vector<6x96xbf16> to vector<4x96xbf16>
    %c1 = arith.constant 1 : index
    %c0_11 = arith.constant 0 : index
    %c0_12 = arith.constant 0 : index
    %11 = vector.load %arg2[%c1, %c0_11, %c0_12] : memref<3x96x64xbf16, #tpu.memory_space<vmem>>, vector<1x96x64xbf16>
    %12 = vector.shape_cast %11 : vector<1x96x64xbf16> to vector<96x64xbf16>
    %cst_13 = arith.constant dense<0.000000e+00> : vector<4x64xf32>
    %13 = tpu.matmul %10, %12, %cst_13 {dimension_numbers = #tpu.dot_dimension_numbers<[1], [0], [0], [1], [0, 0, 1, 1], [], []>} : vector<4x96xbf16>, vector<96x64xbf16>, vector<4x64xf32> -> vector<4x64xf32>
    %14 = arith.addf %7, %13 : vector<4x64xf32>
    %c0_14 = arith.constant 0 : index
    %c0_15 = arith.constant 0 : index
    %c0_16 = arith.constant 0 : index
    %c0_17 = arith.constant 0 : index
    %15 = vector.load %arg1[%c0_14, %c0_15, %c0_16, %c0_17] : memref<1x1x6x96xbf16, #tpu.memory_space<vmem>>, vector<1x1x6x96xbf16>
    %16 = vector.shape_cast %15 : vector<1x1x6x96xbf16> to vector<6x96xbf16>
    %17 = vector.extract_strided_slice %16 {offsets = [2, 0], sizes = [4, 96], strides = [1, 1]} : vector<6x96xbf16> to vector<4x96xbf16>
    %c2 = arith.constant 2 : index
    %c0_18 = arith.constant 0 : index
    %c0_19 = arith.constant 0 : index
    %18 = vector.load %arg2[%c2, %c0_18, %c0_19] : memref<3x96x64xbf16, #tpu.memory_space<vmem>>, vector<1x96x64xbf16>
    %19 = vector.shape_cast %18 : vector<1x96x64xbf16> to vector<96x64xbf16>
    %cst_20 = arith.constant dense<0.000000e+00> : vector<4x64xf32>
    %20 = tpu.matmul %17, %19, %cst_20 {dimension_numbers = #tpu.dot_dimension_numbers<[1], [0], [0], [1], [0, 0, 1, 1], [], []>} : vector<4x96xbf16>, vector<96x64xbf16>, vector<4x64xf32> -> vector<4x64xf32>
    %21 = arith.addf %14, %20 : vector<4x64xf32>
    %22 = arith.truncf %21 : vector<4x64xf32> to vector<4x64xbf16>
    %c0_21 = arith.constant 0 : index
    %c0_22 = arith.constant 0 : index
    %c0_23 = arith.constant 0 : index
    %23 = vector.load %arg3[%c0_21, %c0_22, %c0_23] : memref<1x4x64xbf16, #tpu.memory_space<vmem>>, vector<1x4x64xbf16>
    %24 = vector.shape_cast %23 : vector<1x4x64xbf16> to vector<4x64xbf16>
    %25 = vector.shape_cast %22 : vector<4x64xbf16> to vector<1x4x64xbf16>
    tpu.vector_store %arg3[%c0_21, %c0_22, %c0_23], %25 {strides = array<i32>} : memref<1x4x64xbf16, #tpu.memory_space<vmem>>, vector<1x4x64xbf16>,
    return
  }
  func.func @transform_0(%arg0: i32) -> (i32, i32, i32, i32) {
    %c0_i32 = arith.constant 0 : i32
    %c0_i32_0 = arith.constant 0 : i32
    %c0_i32_1 = arith.constant 0 : i32
    %c0_i32_2 = arith.constant 0 : i32
    return %arg0, %c0_i32, %c0_i32_0, %c0_i32_1 : i32, i32, i32, i32
  }
  func.func @transform_1(%arg0: i32) -> (i32, i32, i32) {
    %c0_i32 = arith.constant 0 : i32
    %c0_i32_0 = arith.constant 0 : i32
    %c0_i32_1 = arith.constant 0 : i32
    %c0_i32_2 = arith.constant 0 : i32
    return %c0_i32, %c0_i32_0, %c0_i32_1 : i32, i32, i32
  }
  func.func @transform_2(%arg0: i32) -> (i32, i32, i32) {
    %c0_i32 = arith.constant 0 : i32
    %c0_i32_0 = arith.constant 0 : i32
    %c0_i32_1 = arith.constant 0 : i32
    return %arg0, %c0_i32, %c0_i32_0 : i32, i32, i32
  }
}

</mosaic_0001>

<bundles_post_ra>
// kernel: fpn_feature_expander_forward.9
= control target key start
LH: loop header
LB: loop body
LE: loop exit
PB: predicated region body
PF: predicated region fallthrough
CT: control target
= control target key end

     0   :  { %s765_s9 = smov 0   ;;  %s887_s0 = inlined_call_operand.vmem [shape: bf16[2,2,17,102], index: 0, kind: input, shape index: {}]   ;;  %s888_s1 = inlined_call_operand.vmem [shape: bf16[3,102,128], index: 1, kind: input, shape index: {}]   ;;  %s889_s2 = inlined_call_operand.vmem [shape: bf16[2,16,128], index: 2, kind: output, shape index: {}]  }
   0x1 LB: > { %s546_s10 = sadd.s32 4294967295, %s746_s9   ;;  %p550_p0 = scmp.ge.s32.totalorder %s746_s9, 1  ;;  %s746_s9 = sphi %s765_s9, %s12_s9  }
   0x2   : > { %p112_p1 = scmp.lt.s32.totalorder %s746_s9, 3 }
   0x4   : > { %p113_p2 = pnand %p550_p0, %p112_p1 }
   0x5   : > { %v716_v0 = vld [vmem:[%s888_s1] sm:$0xff] (!%p113_p2)   ;;  %v748_v1 = vmov (!%p113_p2), 0.0   ;;  %v717_v2 = vld [vmem:[%s888_s1 + $0x8] sm:$0xff] (!%p113_p2)   ;;  %vm749_vm0 = vmmov (!%p113_p2), 0   ;;  %p134_p3 = scmp.lt.s32.totalorder (!%p113_p2), %s546_s10, 1  ;;  %v718_v3 = vld [vmem:[%s888_s1 + $0x10] sm:$0xff] (!%p113_p2)  }
   0x6   : > { %116 = sbr.rel (%p113_p2) target bundleno = 283 (0x11b), region = 28  ;;  %663 = vmatprep.subr.bf16.mxu0 (!%p113_p2), %v748_v1  ;;  %645 = vmatprep.subr.bf16.mxu1 (!%p113_p2), %v748_v1  ;;  %v723_v4 = vld [vmem:[%s888_s1 + $0x34] sm:$0xff] (!%p113_p2)   ;;  %v726_v5 = vld [vmem:[%s888_s1 + $0x3c] sm:$0xff] (!%p113_p2)   ;;  %v728_v7 = vld [vmem:[%s888_s1 + $0x44] sm:$0xff] (!%p113_p2)   ;;  %vm226_vm1 = vcmask (!%p113_p2), 1042432   ;;  %vm222_vm2 = vcmask (!%p113_p2), 834560  }
   0x7   : > { %664 = vmatpush3.bf16.msra.mxu0 (!%p113_p2), %v716_v0  ;;  %677 = vmatprep.mubr.msk.bf16.mxu0 (!%p113_p2), %vm749_vm0, %v748_v1  ;;  %v719_v6 = vld [vmem:[%s888_s1 + $0x18] sm:$0xff] (!%p113_p2)   ;;  %v720_v8 = vld [vmem:[%s888_s1 + $0x20] sm:$0xff] (!%p113_p2)   ;;  %v730_v9 = vld [vmem:[%s888_s1 + $0x4c] sm:$0xff] (!%p113_p2)   ;;  %vm379_vm3 = vsmask.f32 (!%p113_p2), 7424 }
   0x8   : > { %665 = vmatprep.subr.bf16.mxu0 (!%p113_p2), %v748_v1  ;;  %659 = vmatprep.mubr.msk.bf16.mxu1 (!%p113_p2), %vm749_vm0, %v748_v1  ;;  %v722_v10 = vld [vmem:[%s888_s1 + $0x30] ss:$0 sps:$4 sm:$0x77] (!%p113_p2)   ;;  %v721_v11 = vld [vmem:[%s888_s1 + $0x28] sm:$0xff] (!%p113_p2)   ;;  %v732_v12 = vld [vmem:[%s888_s1 + $0x54] sm:$0xff] (!%p113_p2)  }
   0x9   : > { %646 = vmatpush3.bf16.msra.mxu1 (!%p113_p2), %v723_v4  ;;  %v319_v13 = vsel (!%p113_p2), %vm226_vm1, %v722_v10, 0  ;;  %v734_v14 = vld [vmem:[%s888_s1 + $0x5c] sm:$0xff] (!%p113_p2)   ;;  %v736_v16 = vld [vmem:[%s888_s1 + $0x64] ss:$0 sps:$4 sm:$0x77] (!%p113_p2)   ;;  %v725_v17 = vld [vmem:[%s888_s1 + $0x68] sm:$0xff] (!%p113_p2)  }
   0xa   : > { %647 = vmatprep.subr.bf16.mxu1 (!%p113_p2), %v748_v1  ;;  %v228_v18 = vsel (!%p113_p2), %vm226_vm1, %v736_v16, 0  ;;  %v727_v19 = vld [vmem:[%s888_s1 + $0x70] sm:$0xff] (!%p113_p2)   ;;  %v729_v21 = vld [vmem:[%s888_s1 + $0x78] sm:$0xff] (!%p113_p2)   ;;  %v731_v22 = vld [vmem:[%s888_s1 + $0x80] sm:$0xff] (!%p113_p2)  }
   0xb   : > { %666 = vmatpush3.bf16.msra.mxu0 (!%p113_p2), %v717_v2  ;;  %v733_v24 = vld [vmem:[%s888_s1 + $0x88] sm:$0xff] (!%p113_p2)   ;;  %v735_v27 = vld [vmem:[%s888_s1 + $0x90] sm:$0xff] (!%p113_p2)   ;;  %v738_v30 = vld [vmem:[%s888_s1 + $0x98] ss:$0 sps:$4 sm:$0x77] (!%p113_p2)  }
   0xc   : > { %667 = vmatprep.subr.bf16.mxu0 (!%p113_p2), %v748_v1  ;;  %v434_v33 = vsel (!%p113_p2), %vm226_vm1, %v738_v30, 0 }
   0xd   : > { %s891_s10 = smov (!%p134_p3, %s546_s10), 1  ;;  %648 = vmatpush3.bf16.msra.mxu1 %v726_v5 }
   0xe   : > { %s705_s19 = smul.u32 24, %s891_s10  ;;  %649 = vmatprep.subr.bf16.mxu1 %v748_v1 }
   0xf   : > { %668 = vmatpush3.bf16.msra.mxu0 %v718_v3 }
  0x10   : > { %s803_s24 = scalar_lea.vmem %s887_s0, %s705_s19  ;;  %669 = vmatprep.subr.bf16.mxu0 %v748_v1 }
  0x11   : > { %650 = vmatpush3.bf16.msra.mxu1 %v728_v7  ;;  %v724_v15 = vld [vmem:[%s803_s24] sm:$0xff]   ;;  %v737_v20 = vld [vmem:[%s803_s24 + $0xc] sm:$0xff]   ;;  %v739_v25 = vld [vmem:[%s803_s24 + $0x8] ss:$0 sps:$4 sm:$0x11]   ;;  %s613_s24 = sshll.u32 %s891_s10, 3 }
  0x12   : > { %651 = vmatprep.subr.bf16.mxu1 %v748_v1  ;;  %v382_v23 = vshll.u32 %v724_v15, 16  ;;  %v380_v26 = vshrl.u32 %v724_v15, 16  ;;  %v387_v29 = vshll.u32 %v739_v25, 16  ;;  %s143_s6 = scalar_lea.vmem %s889_s2, %s613_s24 }
  0x13   : > { %670 = vmatpush3.bf16.msra.mxu0 %v719_v6 }
  0x14   : > { %671 = vmatprep.subr.bf16.mxu0 %v748_v1  ;;  %v384_v28 = vrot.slane %v382_v23, 1  ;;  %v389_v32 = vrot.slane %v387_v29, 1 }
  0x15   : > { %652 = vmatpush3.bf16.msra.mxu1 %v730_v9 }
  0x16   : > { %653 = vmatprep.subr.bf16.mxu1 %v748_v1  ;;  %v385_v31 = vor.u32 %v384_v28, %v380_v26 }
  0x17   : > { %672 = vmatpush3.bf16.msra.mxu0 %v720_v8 }
  0x18   : > { %673 = vmatprep.subr.bf16.mxu0 %v748_v1  ;;  %v390_v34 = vsel %vm379_vm3, %v385_v31, %v389_v32 }
  0x19   : > { %654 = vmatpush3.bf16.msra.mxu1 %v732_v12 }
  0x1a   : > { %655 = vmatprep.subr.bf16.mxu1 %v748_v1 }
  0x1b   : > { %674 = vmatpush3.bf16.msra.mxu0 %v721_v11 }
  0x1c   : > { %675 = vmatprep.subr.bf16.mxu0 %v748_v1 }
  0x1d   : > { %656 = vmatpush3.bf16.msra.mxu1 %v734_v14 }
  0x1e   : > { %657 = vmatprep.subr.bf16.mxu1 %v748_v1 }
  0x1f   : > { %676 = vmatpush3.bf16.msra.mxu0 %v319_v13 }
  0x20   : > { %681 = vmatprep.subr.bf16.mxu0 %v748_v1 }
  0x21   : > { %658 = vmatpush3.bf16.msra.mxu1 %v228_v18 }
  0x22   : > { %678 = vmatmul.mubr.msk.bf16.vlgmr.msra.gmra.mrb[0].mxu0 %vm222_vm2, %v724_v15 }
  0x23   : > { %682 = vmatpush3.bf16.msra.mxu0 %v725_v17  ;;  %695 = vmatprep.mubr.msk.bf16.mxu0 %vm749_vm0, %v748_v1 }
  0x24   : > { %683 = vmatprep.subr.bf16.mxu0 %v748_v1  ;;  %660 = vmatmul.mubr.msk.bf16.vlgmr.msra.gmra.mrb[0].mxu1 %vm222_vm2, %v737_v20 }
  0x27   : > { %684 = vmatpush3.bf16.msra.mxu0 %v727_v19 }
  0x28   : > { %685 = vmatprep.subr.bf16.mxu0 %v748_v1 }
  0x2b   : > { %686 = vmatpush3.bf16.msra.mxu0 %v729_v21 }
  0x2c   : > { %687 = vmatprep.subr.bf16.mxu0 %v748_v1 }
  0x2f   : > { %688 = vmatpush3.bf16.msra.mxu0 %v731_v22 }
  0x30   : > { %689 = vmatprep.subr.bf16.mxu0 %v748_v1 }
  0x33   : > { %690 = vmatpush3.bf16.msra.mxu0 %v733_v24 }
  0x34   : > { %691 = vmatprep.subr.bf16.mxu0 %v748_v1 }
  0x37   : > { %692 = vmatpush3.bf16.msra.mxu0 %v735_v27 }
  0x38   : > { %693 = vmatprep.subr.bf16.mxu0 %v748_v1 }
  0x3b   : > { %694 = vmatpush3.bf16.msra.mxu0 %v434_v33 }
  0x3e   : > { %696 = vmatmul.mubr.msk.bf16.vlgmr.msra.gmra.mrb[0].mxu0 %vm222_vm2, %v390_v34 }
  0xf7   : > { %v264_v35 = vpop.f32.mrb[0].mxu1 }
  0xf8   : > { %v661_v36 = vpop.f32.mrb[1].mxu1 }
  0xf9   : > { %v267_v37 = vpop.f32.mrb[2].mxu1 }
  0xfa   : > { %v662_v38 = vpop.f32.mrb[3].mxu1 }
 0x111   : > { %v470_v39 = vpop.f32.mrb[0].mxu0 }
 0x112   : > { %v699_v40 = vadd.f32 %v470_v39, %v264_v35  ;;  %v697_v41 = vpop.f32.mrb[1].mxu0 }
 0x113   : > { %v473_v42 = vpop.f32.mrb[2].mxu0 }
 0x114   : > { %v700_v43 = vadd.f32 %v473_v42, %v267_v37  ;;  %v698_v44 = vpop.f32.mrb[3].mxu0  ;;  %v479_v45 = vmax.f32 %v699_v40, 0.0 }
 0x116   : > { %v480_v46 = vmax.f32 %v700_v43, 0.0 }
 0x118   : > { %v619_v47 = vpack.c.bf16 %v480_v46, %v479_v45 }
 0x11a   : > { %620 = vst [vmem:[%s143_s6] sm:$0xff] %v619_v47  }
 0x11b PF: > { %s12_s9 = sadd.s32 1, %s746_s9  }
 0x11c   : > { %p9_p4 = scmp.ge.s32.totalorder %s12_s9, 4  }
 0x11e   :  { %11 = sbr.rel (!%p9_p4) target bundleno = 1 (0x1), region = 61 }

// kernel: fpn_feature_expander_forward.10
= control target key start
LH: loop header
LB: loop body
LE: loop exit
PB: predicated region body
PF: predicated region fallthrough
CT: control target
= control target key end

     0   :  { %s739_s9 = smov 0   ;;  %s884_s0 = inlined_call_operand.vmem [shape: bf16[2,2,9,144], index: 0, kind: input, shape index: {}]   ;;  %s885_s1 = inlined_call_operand.vmem [shape: bf16[3,144,128], index: 1, kind: input, shape index: {}]   ;;  %s886_s2 = inlined_call_operand.vmem [shape: bf16[2,8,128], index: 2, kind: output, shape index: {}]  }
   0x1 LB: > { %s584_s10 = sadd.s32 4294967295, %s721_s9   ;;  %p588_p0 = scmp.ge.s32.totalorder %s721_s9, 1  ;;  %s721_s9 = sphi %s739_s9, %s12_s9  }
   0x2   : > { %p112_p1 = scmp.lt.s32.totalorder %s721_s9, 3 }
   0x4   : > { %p113_p2 = pnand %p588_p0, %p112_p1 }
   0x5   : > { %v682_v0 = vld [vmem:[%s885_s1] sm:$0xff] (!%p113_p2)   ;;  %v723_v1 = vmov (!%p113_p2), 0   ;;  %p133_p3 = scmp.lt.s32.totalorder (!%p113_p2), %s584_s10, 1  ;;  %v683_v2 = vld [vmem:[%s885_s1 + $0x8] sm:$0xff] (!%p113_p2)   ;;  %v684_v3 = vld [vmem:[%s885_s1 + $0x10] sm:$0xff] (!%p113_p2)   ;;  %vm244_vm0 = vcmask (!%p113_p2), 130048  }
   0x6   : > { %116 = sbr.rel (%p113_p2) target bundleno = 297 (0x129), region = 28  ;;  %351 = vmatprep.subr.bf16.mxu0 (!%p113_p2), %v723_v1  ;;  %248 = vmatprep.subr.bf16.mxu1 (!%p113_p2), %v723_v1  ;;  %v691_v4 = vld [vmem:[%s885_s1 + $0x48] sm:$0xff] (!%p113_p2)   ;;  %v685_v5 = vld [vmem:[%s885_s1 + $0x18] sm:$0xff] (!%p113_p2)   ;;  %v697_v8 = vld [vmem:[%s885_s1 + $0x50] sm:$0xff] (!%p113_p2)  }
   0x7   : > { %352 = vmatpush1.bf16.msra.mxu0 (!%p113_p2), %v682_v0  ;;  %249 = vmatpush1.bf16.msra.mxu1 (!%p113_p2), %v691_v4  ;;  %v686_v9 = vld [vmem:[%s885_s1 + $0x20] sm:$0xff] (!%p113_p2)   ;;  %v699_v10 = vld [vmem:[%s885_s1 + $0x58] sm:$0xff] (!%p113_p2)   ;;  %v687_v11 = vld [vmem:[%s885_s1 + $0x28] sm:$0xff] (!%p113_p2)  }
   0x8   : > { %353 = vmatprep.subr.bf16.mxu0 (!%p113_p2), %v723_v1  ;;  %250 = vmatprep.subr.bf16.mxu1 (!%p113_p2), %v723_v1  ;;  %v701_v13 = vld [vmem:[%s885_s1 + $0x60] sm:$0xff] (!%p113_p2)   ;;  %v688_v14 = vld [vmem:[%s885_s1 + $0x30] sm:$0xff] (!%p113_p2)   ;;  %v703_v16 = vld [vmem:[%s885_s1 + $0x68] sm:$0xff] (!%p113_p2)  }
   0x9   : > { %v689_v17 = vld [vmem:[%s885_s1 + $0x38] sm:$0xff] (!%p113_p2)   ;;  %v705_v20 = vld [vmem:[%s885_s1 + $0x70] sm:$0xff] (!%p113_p2)   ;;  %v690_v22 = vld [vmem:[%s885_s1 + $0x40] sm:$0xff] (!%p113_p2)  }
   0xa   : > { %v707_v25 = vld [vmem:[%s885_s1 + $0x78] sm:$0xff] (!%p113_p2)   ;;  %v696_v27 = vld [vmem:[%s885_s1 + $0x90] sm:$0xff] (!%p113_p2)   ;;  %v709_v29 = vld [vmem:[%s885_s1 + $0x80] sm:$0xff] (!%p113_p2)  }
   0xb   : > { %354 = vmatpush1.bf16.msra.mxu0 (!%p113_p2), %v683_v2  ;;  %251 = vmatpush1.bf16.msra.mxu1 (!%p113_p2), %v697_v8  ;;  %v698_v30 = vld [vmem:[%s885_s1 + $0x98] sm:$0xff] (!%p113_p2)   ;;  %v711_v31 = vld [vmem:[%s885_s1 + $0x88] sm:$0xff] (!%p113_p2)   ;;  %v700_v32 = vld [vmem:[%s885_s1 + $0xa0] sm:$0xff] (!%p113_p2)  }
   0xc   : > { %355 = vmatprep.subr.bf16.mxu0 (!%p113_p2), %v723_v1  ;;  %252 = vmatprep.subr.bf16.mxu1 (!%p113_p2), %v723_v1  ;;  %v702_v34 = vld [vmem:[%s885_s1 + $0xa8] sm:$0xff] (!%p113_p2)   ;;  %v704_v35 = vld [vmem:[%s885_s1 + $0xb0] sm:$0xff] (!%p113_p2)   ;;  %v706_v36 = vld [vmem:[%s885_s1 + $0xb8] sm:$0xff] (!%p113_p2)  }
   0xd   : > { %s888_s10 = smov (!%p133_p3, %s584_s10), 1  ;;  %v708_v38 = vld [vmem:[%s885_s1 + $0xc0] sm:$0xff]   ;;  %v710_v40 = vld [vmem:[%s885_s1 + $0xc8] sm:$0xff]   ;;  %v714_v43 = vld [vmem:[%s885_s1 + $0xd0] sm:$0xff]  }
   0xe   : > { %s667_s15 = sshll.u32 %s888_s10, 5  ;;  %s591_s17 = sshll.u32 %s888_s10, 2 }
   0xf   : > { %s766_s20 = scalar_lea.vmem %s884_s0, %s667_s15  ;;  %356 = vmatpush1.bf16.msra.mxu0 %v684_v3  ;;  %253 = vmatpush1.bf16.msra.mxu1 %v699_v10 }
  0x10   : > { %v775_v6 = vld [vmem:[%s766_s20] sm:$0xff]  ;;  %357 = vmatprep.subr.bf16.mxu0 %v723_v1  ;;  %v144_v12 = vld [vmem:[%s766_s20 + $0x8] sm:$0x11]  ;;  %254 = vmatprep.subr.bf16.mxu1 %v723_v1  ;;  %v592_v18 = vld [vmem:[%s766_s20 + $0x10] sm:$0xff]  ;;  %s141_s20 = scalar_lea.vmem %s886_s2, %s591_s17 }
  0x11   : > { %v624_v7 = vcombine.high %v775_v6, %v775_v6  ;;  %v654_v15 = vcombine.high %v775_v6, %v144_v12  ;;  %v612_v21 = vcombine.high %v592_v18, %v592_v18  ;;  %v623_v26 = vcombine.low %v775_v6, %v775_v6 }
  0x12   : > { %v611_v33 = vcombine.low %v592_v18, %v592_v18  ;;  %v653_v37 = vcombine.low %v775_v6, %v144_v12 }
  0x13   : > { %634 = vmatprep.mubr.msk.bf16.mxu0 %vm244_vm0, %v624_v7  ;;  %358 = vmatpush1.bf16.msra.mxu0 %v685_v5  ;;  %v425_v19 = vshll.u32 %v654_v15, 16  ;;  %v423_v23 = vshrl.u32 %v654_v15, 16 }
  0x14   : > { %359 = vmatprep.subr.bf16.mxu0 %v723_v1  ;;  %255 = vmatpush1.bf16.msra.mxu1 %v701_v13  ;;  %v418_v39 = vshll.u32 %v653_v37, 16  ;;  %v416_v41 = vshrl.u32 %v653_v37, 16 }
  0x15   : > { %256 = vmatprep.subr.bf16.mxu1 %v723_v1  ;;  %622 = vmatprep.mubr.msk.bf16.mxu1 %vm244_vm0, %v612_v21  ;;  %v427_v24 = vrot.slane %v425_v19, 1 }
  0x16   : > { %v420_v42 = vrot.slane %v418_v39, 1 }
  0x17   : > { %360 = vmatpush1.bf16.msra.mxu0 %v686_v9  ;;  %v428_v28 = vor.u32 %v427_v24, %v423_v23 }
  0x18   : > { %361 = vmatprep.subr.bf16.mxu0 %v723_v1  ;;  %257 = vmatpush1.bf16.msra.mxu1 %v703_v16  ;;  %v421_v44 = vor.u32 %v420_v42, %v416_v41 }
  0x19   : > { %258 = vmatprep.subr.bf16.mxu1 %v723_v1 }
  0x1b   : > { %362 = vmatpush1.bf16.msra.mxu0 %v687_v11 }
  0x1c   : > { %363 = vmatprep.subr.bf16.mxu0 %v723_v1  ;;  %259 = vmatpush1.bf16.msra.mxu1 %v705_v20 }
  0x1d   : > { %260 = vmatprep.subr.bf16.mxu1 %v723_v1 }
  0x1f   : > { %364 = vmatpush1.bf16.msra.mxu0 %v688_v14 }
  0x20   : > { %365 = vmatprep.subr.bf16.mxu0 %v723_v1  ;;  %261 = vmatpush1.bf16.msra.mxu1 %v707_v25 }
  0x21   : > { %262 = vmatprep.subr.bf16.mxu1 %v723_v1 }
  0x23   : > { %366 = vmatpush1.bf16.msra.mxu0 %v689_v17 }
  0x24   : > { %367 = vmatprep.subr.bf16.mxu0 %v723_v1  ;;  %263 = vmatpush1.bf16.msra.mxu1 %v709_v29 }
  0x25   : > { %264 = vmatprep.subr.bf16.mxu1 %v723_v1 }
  0x27   : > { %368 = vmatpush1.bf16.msra.mxu0 %v690_v22 }
  0x28   : > { %487 = vmatprep.subr.bf16.mxu0 %v723_v1  ;;  %265 = vmatpush1.bf16.msra.mxu1 %v711_v31 }
  0x2a   : > { %384 = vmatmul.mubr.bf16.vlgmr.msra.gmra.mrb[0].mxu0 %v623_v26 }
  0x2b   : > { %488 = vmatpush1.bf16.msra.mxu0 %v696_v27  ;;  %664 = vmatprep.mubr.msk.bf16.mxu0 %vm244_vm0, %v428_v28 }
  0x2c   : > { %489 = vmatprep.subr.bf16.mxu0 %v723_v1  ;;  %281 = vmatmul.mubr.bf16.vlgmr.msra.gmra.mrb[0].mxu1 %v611_v33 }
  0x2f   : > { %490 = vmatpush1.bf16.msra.mxu0 %v698_v30 }
  0x30   : > { %491 = vmatprep.subr.bf16.mxu0 %v723_v1 }
  0x33   : > { %492 = vmatpush1.bf16.msra.mxu0 %v700_v32 }
  0x34   : > { %493 = vmatprep.subr.bf16.mxu0 %v723_v1 }
  0x37   : > { %494 = vmatpush1.bf16.msra.mxu0 %v702_v34 }
  0x38   : > { %495 = vmatprep.subr.bf16.mxu0 %v723_v1 }
  0x3b   : > { %496 = vmatpush1.bf16.msra.mxu0 %v704_v35 }
  0x3c   : > { %497 = vmatprep.subr.bf16.mxu0 %v723_v1 }
  0x3f   : > { %498 = vmatpush1.bf16.msra.mxu0 %v706_v36 }
  0x40   : > { %499 = vmatprep.subr.bf16.mxu0 %v723_v1 }
  0x43   : > { %500 = vmatpush1.bf16.msra.mxu0 %v708_v38 }
  0x44   : > { %501 = vmatprep.subr.bf16.mxu0 %v723_v1 }
  0x47   : > { %502 = vmatpush1.bf16.msra.mxu0 %v710_v40 }
  0x48   : > { %503 = vmatprep.subr.bf16.mxu0 %v723_v1 }
  0x4b   : > { %504 = vmatpush1.bf16.msra.mxu0 %v714_v43 }
  0x4e   : > { %520 = vmatmul.mubr.bf16.vlgmr.msra.gmra.mrb[0].mxu0 %v421_v44 }
  0xff   : > { %v282_v45 = vpop.f32.mrb[0].mxu1 }
 0x100   : > { %v284_v46 = vpop.f32.mrb[1].mxu1 }
 0x101   : > { %v285_v47 = vpop.f32.mrb[2].mxu1 }
 0x102   : > { %v286_v48 = vpop.f32.mrb[3].mxu1 }
 0x121   : > { %v521_v49 = vpop.f32.mrb[0].mxu0 }
 0x122   : > { %v668_v50 = vadd.f32 %v521_v49, %v282_v45  ;;  %v523_v51 = vpop.f32.mrb[1].mxu0 }
 0x123   : > { %v524_v52 = vpop.f32.mrb[2].mxu0 }
 0x124   : > { %v528_v53 = vmax.f32 %v668_v50, 0.0  ;;  %v525_v54 = vpop.f32.mrb[3].mxu0 }
 0x126   : > { %v529_v55 = vpack.c.bf16 %v528_v53, %v528_v53 }
 0x128   : > { %530 = vst [vmem:[%s141_s20] sm:$0xf] %v529_v55 }
 0x129 PF: > { %s12_s9 = sadd.s32 1, %s721_s9  }
 0x12a   : > { %p9_p4 = scmp.ge.s32.totalorder %s12_s9, 4  }
 0x12c   :  { %11 = sbr.rel (!%p9_p4) target bundleno = 1 (0x1), region = 61 }

// kernel: fpn_feature_expander_forward.11
= control target key start
LH: loop header
LB: loop body
LE: loop exit
PB: predicated region body
PF: predicated region fallthrough
CT: control target
= control target key end

     0   :  { %s762_s9 = smov 0   ;;  %s910_s0 = inlined_call_operand.vmem [shape: bf16[2,2,5,160], index: 0, kind: input, shape index: {}]   ;;  %s911_s1 = inlined_call_operand.vmem [shape: bf16[3,160,128], index: 1, kind: input, shape index: {}]   ;;  %s912_s2 = inlined_call_operand.vmem [shape: bf16[2,4,128], index: 2, kind: output, shape index: {}]  }
   0x1 LB: > { %s601_s10 = sadd.s32 4294967295, %s744_s9   ;;  %p605_p0 = scmp.ge.s32.totalorder %s744_s9, 1  ;;  %s744_s9 = sphi %s762_s9, %s12_s9  }
   0x2   : > { %p112_p1 = scmp.lt.s32.totalorder %s744_s9, 3 }
   0x4   : > { %p113_p2 = pnand %p605_p0, %p112_p1 }
   0x5   : > { %v704_v0 = vld [vmem:[%s911_s1] sm:$0xff] (!%p113_p2)   ;;  %v746_v1 = vmov (!%p113_p2), 0   ;;  %p133_p3 = scmp.lt.s32.totalorder (!%p113_p2), %s601_s10, 1  ;;  %v705_v2 = vld [vmem:[%s911_s1 + $0x8] sm:$0xff] (!%p113_p2)   ;;  %v706_v3 = vld [vmem:[%s911_s1 + $0x10] sm:$0xff] (!%p113_p2)   ;;  %vm253_vm0 = vcmask (!%p113_p2), 261120  }
   0x6   : > { %116 = sbr.rel (%p113_p2) target bundleno = 305 (0x131), region = 28  ;;  %366 = vmatprep.subr.bf16.mxu0 (!%p113_p2), %v746_v1  ;;  %257 = vmatprep.subr.bf16.mxu1 (!%p113_p2), %v746_v1  ;;  %v707_v4 = vld [vmem:[%s911_s1 + $0x18] sm:$0xff] (!%p113_p2)   ;;  %v714_v5 = vld [vmem:[%s911_s1 + $0x50] sm:$0xff] (!%p113_p2)   ;;  %v708_v9 = vld [vmem:[%s911_s1 + $0x20] sm:$0xff] (!%p113_p2)  }
   0x7   : > { %367 = vmatpush1.bf16.msra.mxu0 (!%p113_p2), %v704_v0  ;;  %258 = vmatpush1.bf16.msra.mxu1 (!%p113_p2), %v714_v5  ;;  %v718_v8 = vld [vmem:[%s911_s1 + $0x58] sm:$0xff] (!%p113_p2)   ;;  %v720_v10 = vld [vmem:[%s911_s1 + $0x60] sm:$0xff] (!%p113_p2)   ;;  %v709_v11 = vld [vmem:[%s911_s1 + $0x28] sm:$0xff] (!%p113_p2)  }
   0x8   : > { %368 = vmatprep.subr.bf16.mxu0 (!%p113_p2), %v746_v1  ;;  %259 = vmatprep.subr.bf16.mxu1 (!%p113_p2), %v746_v1  ;;  %v722_v12 = vld [vmem:[%s911_s1 + $0x68] sm:$0xff] (!%p113_p2)   ;;  %v710_v13 = vld [vmem:[%s911_s1 + $0x30] sm:$0xff] (!%p113_p2)   ;;  %v711_v15 = vld [vmem:[%s911_s1 + $0x38] sm:$0xff] (!%p113_p2)  }
   0x9   : > { %v724_v14 = vld [vmem:[%s911_s1 + $0x70] sm:$0xff] (!%p113_p2)   ;;  %v726_v16 = vld [vmem:[%s911_s1 + $0x78] sm:$0xff] (!%p113_p2)   ;;  %v712_v18 = vld [vmem:[%s911_s1 + $0x40] sm:$0xff] (!%p113_p2)  }
   0xa   : > { %v728_v21 = vld [vmem:[%s911_s1 + $0x80] sm:$0xff] (!%p113_p2)   ;;  %v713_v22 = vld [vmem:[%s911_s1 + $0x48] sm:$0xff] (!%p113_p2)   ;;  %v732_v29 = vld [vmem:[%s911_s1 + $0x90] sm:$0xff] (!%p113_p2)  }
   0xb   : > { %369 = vmatpush1.bf16.msra.mxu0 (!%p113_p2), %v705_v2  ;;  %260 = vmatpush1.bf16.msra.mxu1 (!%p113_p2), %v718_v8  ;;  %v730_v25 = vld [vmem:[%s911_s1 + $0x88] sm:$0xff] (!%p113_p2)   ;;  %v717_v27 = vld [vmem:[%s911_s1 + $0xa0] sm:$0xff] (!%p113_p2)   ;;  %v734_v31 = vld [vmem:[%s911_s1 + $0x98] sm:$0xff] (!%p113_p2)  }
   0xc   : > { %370 = vmatprep.subr.bf16.mxu0 (!%p113_p2), %v746_v1  ;;  %261 = vmatprep.subr.bf16.mxu1 (!%p113_p2), %v746_v1  ;;  %v719_v30 = vld [vmem:[%s911_s1 + $0xa8] sm:$0xff] (!%p113_p2)   ;;  %v721_v32 = vld [vmem:[%s911_s1 + $0xb0] sm:$0xff] (!%p113_p2)   ;;  %v723_v34 = vld [vmem:[%s911_s1 + $0xb8] sm:$0xff] (!%p113_p2)  }
   0xd   : > { %s914_s10 = smov (!%p133_p3, %s601_s10), 1  ;;  %v725_v35 = vld [vmem:[%s911_s1 + $0xc0] sm:$0xff]   ;;  %v727_v36 = vld [vmem:[%s911_s1 + $0xc8] sm:$0xff]   ;;  %v729_v37 = vld [vmem:[%s911_s1 + $0xd0] sm:$0xff]  }
   0xe   : > { %s689_s15 = sshll.u32 %s914_s10, 4  ;;  %v731_v38 = vld [vmem:[%s911_s1 + $0xd8] sm:$0xff]   ;;  %v733_v40 = vld [vmem:[%s911_s1 + $0xe0] sm:$0xff]   ;;  %v737_v43 = vld [vmem:[%s911_s1 + $0xe8] sm:$0xff]   ;;  %s608_s23 = sshll.u32 %s914_s10, 1 }
   0xf   : > { %s789_s20 = scalar_lea.vmem %s910_s0, %s689_s15  ;;  %371 = vmatpush1.bf16.msra.mxu0 %v706_v3  ;;  %262 = vmatpush1.bf16.msra.mxu1 %v720_v10  ;;  %s141_s26 = scalar_lea.vmem %s912_s2, %s608_s23 }
  0x10   : > { %372 = vmatprep.subr.bf16.mxu0 %v746_v1  ;;  %v143_v6 = vld [vmem:[%s789_s20] sm:$0x77]  ;;  %263 = vmatprep.subr.bf16.mxu1 %v746_v1  ;;  %v609_v17 = vld [vmem:[%s789_s20 + $0x8] sm:$0x77] }
  0x11   : > { %v644_v7 = vcombine.high %v143_v6, %v143_v6  ;;  %v631_v20 = vcombine.high %v609_v17, %v609_v17  ;;  %v643_v26 = vcombine.low %v143_v6, %v143_v6  ;;  %v630_v33 = vcombine.low %v609_v17, %v609_v17 }
  0x13   : > { %373 = vmatpush1.bf16.msra.mxu0 %v707_v4  ;;  %655 = vmatprep.mubr.msk.bf16.mxu0 %vm253_vm0, %v644_v7  ;;  %v436_v19 = vshll.u32 %v644_v7, 16  ;;  %v434_v23 = vshrl.u32 %v644_v7, 16  ;;  %v430_v39 = vshll.u32 %v643_v26, 16  ;;  %v428_v41 = vshrl.u32 %v643_v26, 16 }
  0x14   : > { %374 = vmatprep.subr.bf16.mxu0 %v746_v1  ;;  %264 = vmatpush1.bf16.msra.mxu1 %v722_v12 }
  0x15   : > { %265 = vmatprep.subr.bf16.mxu1 %v746_v1  ;;  %642 = vmatprep.mubr.msk.bf16.mxu1 %vm253_vm0, %v631_v20  ;;  %v438_v24 = vrot.slane %v436_v19, 1  ;;  %v432_v42 = vrot.slane %v430_v39, 1 }
  0x17   : > { %375 = vmatpush1.bf16.msra.mxu0 %v708_v9  ;;  %v439_v28 = vor.u32 %v438_v24, %v434_v23  ;;  %v433_v44 = vor.u32 %v432_v42, %v428_v41 }
  0x18   : > { %376 = vmatprep.subr.bf16.mxu0 %v746_v1  ;;  %266 = vmatpush1.bf16.msra.mxu1 %v724_v14 }
  0x19   : > { %267 = vmatprep.subr.bf16.mxu1 %v746_v1 }
  0x1b   : > { %377 = vmatpush1.bf16.msra.mxu0 %v709_v11 }
  0x1c   : > { %378 = vmatprep.subr.bf16.mxu0 %v746_v1  ;;  %268 = vmatpush1.bf16.msra.mxu1 %v726_v16 }
  0x1d   : > { %269 = vmatprep.subr.bf16.mxu1 %v746_v1 }
  0x1f   : > { %379 = vmatpush1.bf16.msra.mxu0 %v710_v13 }
  0x20   : > { %380 = vmatprep.subr.bf16.mxu0 %v746_v1  ;;  %270 = vmatpush1.bf16.msra.mxu1 %v728_v21 }
  0x21   : > { %271 = vmatprep.subr.bf16.mxu1 %v746_v1 }
  0x23   : > { %381 = vmatpush1.bf16.msra.mxu0 %v711_v15 }
  0x24   : > { %382 = vmatprep.subr.bf16.mxu0 %v746_v1  ;;  %272 = vmatpush1.bf16.msra.mxu1 %v730_v25 }
  0x25   : > { %273 = vmatprep.subr.bf16.mxu1 %v746_v1 }
  0x27   : > { %383 = vmatpush1.bf16.msra.mxu0 %v712_v18 }
  0x28   : > { %384 = vmatprep.subr.bf16.mxu0 %v746_v1  ;;  %274 = vmatpush1.bf16.msra.mxu1 %v732_v29 }
  0x29   : > { %275 = vmatprep.subr.bf16.mxu1 %v746_v1 }
  0x2b   : > { %385 = vmatpush1.bf16.msra.mxu0 %v713_v22 }
  0x2c   : > { %504 = vmatprep.subr.bf16.mxu0 %v746_v1  ;;  %276 = vmatpush1.bf16.msra.mxu1 %v734_v31 }
  0x2e   : > { %399 = vmatmul.mubr.bf16.vlgmr.msra.gmra.mrb[0].mxu0 %v643_v26 }
  0x2f   : > { %505 = vmatpush1.bf16.msra.mxu0 %v717_v27  ;;  %686 = vmatprep.mubr.msk.bf16.mxu0 %vm253_vm0, %v439_v28 }
  0x30   : > { %506 = vmatprep.subr.bf16.mxu0 %v746_v1  ;;  %290 = vmatmul.mubr.bf16.vlgmr.msra.gmra.mrb[0].mxu1 %v630_v33 }
  0x33   : > { %507 = vmatpush1.bf16.msra.mxu0 %v719_v30 }
  0x34   : > { %508 = vmatprep.subr.bf16.mxu0 %v746_v1 }
  0x37   : > { %509 = vmatpush1.bf16.msra.mxu0 %v721_v32 }
  0x38   : > { %510 = vmatprep.subr.bf16.mxu0 %v746_v1 }
  0x3b   : > { %511 = vmatpush1.bf16.msra.mxu0 %v723_v34 }
  0x3c   : > { %512 = vmatprep.subr.bf16.mxu0 %v746_v1 }
  0x3f   : > { %513 = vmatpush1.bf16.msra.mxu0 %v725_v35 }
  0x40   : > { %514 = vmatprep.subr.bf16.mxu0 %v746_v1 }
  0x43   : > { %515 = vmatpush1.bf16.msra.mxu0 %v727_v36 }
  0x44   : > { %516 = vmatprep.subr.bf16.mxu0 %v746_v1 }
  0x47   : > { %517 = vmatpush1.bf16.msra.mxu0 %v729_v37 }
  0x48   : > { %518 = vmatprep.subr.bf16.mxu0 %v746_v1 }
  0x4b   : > { %519 = vmatpush1.bf16.msra.mxu0 %v731_v38 }
  0x4c   : > { %520 = vmatprep.subr.bf16.mxu0 %v746_v1 }
  0x4f   : > { %521 = vmatpush1.bf16.msra.mxu0 %v733_v40 }
  0x50   : > { %522 = vmatprep.subr.bf16.mxu0 %v746_v1 }
  0x53   : > { %523 = vmatpush1.bf16.msra.mxu0 %v737_v43 }
  0x56   : > { %537 = vmatmul.mubr.bf16.vlgmr.msra.gmra.mrb[0].mxu0 %v433_v44 }
 0x103   : > { %v291_v45 = vpop.f32.mrb[0].mxu1 }
 0x104   : > { %v293_v46 = vpop.f32.mrb[1].mxu1 }
 0x105   : > { %v294_v47 = vpop.f32.mrb[2].mxu1 }
 0x106   : > { %v295_v48 = vpop.f32.mrb[3].mxu1 }
 0x129   : > { %v538_v49 = vpop.f32.mrb[0].mxu0 }
 0x12a   : > { %v690_v50 = vadd.f32 %v538_v49, %v291_v45  ;;  %v540_v51 = vpop.f32.mrb[1].mxu0 }
 0x12b   : > { %v541_v52 = vpop.f32.mrb[2].mxu0 }
 0x12c   : > { %v545_v53 = vmax.f32 %v690_v50, 0.0  ;;  %v542_v54 = vpop.f32.mrb[3].mxu0 }
 0x12e   : > { %v546_v55 = vpack.c.bf16 %v545_v53, %v545_v53 }
 0x130   : > { %547 = vst [vmem:[%s141_s26] sm:$0x3] %v546_v55 }
 0x131 PF: > { %s12_s9 = sadd.s32 1, %s744_s9  }
 0x132   : > { %p9_p4 = scmp.ge.s32.totalorder %s12_s9, 4  }
 0x134   :  { %11 = sbr.rel (!%p9_p4) target bundleno = 1 (0x1), region = 61 }

// kernel: fpn_feature_expander_forward.12
= control target key start
LH: loop header
LB: loop body
LE: loop exit
PB: predicated region body
PF: predicated region fallthrough
CT: control target
= control target key end

     0   :  { %s390_s9 = smov 0   ;;  %s431_s0 = inlined_call_operand.vmem [shape: bf16[2,1,4,128], index: 0, kind: input, shape index: {}]   ;;  %s432_s1 = inlined_call_operand.vmem [shape: bf16[1,128,64], index: 1, kind: input, shape index: {}]   ;;  %s433_s2 = inlined_call_operand.vmem [shape: bf16[2,4,64], index: 2, kind: output, shape index: {}]  }
   0x1 LB: > { %s301_s10 = sadd.s32 4294967295, %s371_s9   ;;  %p305_p0 = scmp.ge.s32.totalorder %s371_s9, 1  ;;  %s371_s9 = sphi %s390_s9, %s12_s9  }
   0x2   : > { %p111_p1 = scmp.lt.s32.totalorder %s371_s9, 3 }
   0x4   : > { %p112_p2 = pnand %p305_p0, %p111_p1 }
   0x5   : > { %v357_v0 = vld [vmem:[%s432_s1] sm:$0xff] (!%p112_p2)   ;;  %v373_v1 = vmov (!%p112_p2), 0.0   ;;  %v358_v2 = vld [vmem:[%s432_s1 + $0x8] sm:$0xff] (!%p112_p2)   ;;  %vm374_vm0 = vmmov (!%p112_p2), 0   ;;  %v359_v3 = vld [vmem:[%s432_s1 + $0x10] sm:$0xff] (!%p112_p2)   ;;  %p131_p3 = scmp.lt.s32.totalorder (!%p112_p2), %s301_s10, 1 }
   0x6   : > { %115 = sbr.rel (%p112_p2) target bundleno = 253 (0xfd), region = 28  ;;  %327 = vmatprep.subr.bf16.mxu0 (!%p112_p2), %v373_v1  ;;  %343 = vmatprep.mubr.msk.bf16.mxu0 (!%p112_p2), %vm374_vm0, %v373_v1  ;;  %v360_v4 = vld [vmem:[%s432_s1 + $0x18] sm:$0xff] (!%p112_p2)   ;;  %v361_v5 = vld [vmem:[%s432_s1 + $0x20] sm:$0xff] (!%p112_p2)   ;;  %v362_v6 = vld [vmem:[%s432_s1 + $0x28] sm:$0xff] (!%p112_p2)   ;;  %vm246_vm1 = vcmask (!%p112_p2), 517120  }
   0x7   : > { %328 = vmatpush3.bf16.msra.mxu0 (!%p112_p2), %v357_v0  ;;  %v363_v7 = vld [vmem:[%s432_s1 + $0x30] sm:$0xff] (!%p112_p2)   ;;  %v364_v8 = vld [vmem:[%s432_s1 + $0x38] sm:$0xff] (!%p112_p2)  }
   0x8   : > { %329 = vmatprep.subr.bf16.mxu0 (!%p112_p2), %v373_v1 }
   0xb   : > { %330 = vmatpush3.bf16.msra.mxu0 (!%p112_p2), %v358_v2 }
   0xc   : > { %331 = vmatprep.subr.bf16.mxu0 (!%p112_p2), %v373_v1 }
   0xd   : > { %s435_s10 = smov (!%p131_p3, %s301_s10), 1 }
   0xe   : > { %s306_s25 = sshll.u32 %s435_s10, 1 }
   0xf   : > { %332 = vmatpush3.bf16.msra.mxu0 %v359_v3  ;;  %s134_s30 = scalar_lea.vmem %s431_s0, %s306_s25  ;;  %s138_s5 = scalar_lea.vmem %s433_s2, %s306_s25 }
  0x10   : > { %333 = vmatprep.subr.bf16.mxu0 %v373_v1  ;;  %v140_v9 = vld [vmem:[%s134_s30] sm:$0x3] }
  0x13   : > { %334 = vmatpush3.bf16.msra.mxu0 %v360_v4 }
  0x14   : > { %335 = vmatprep.subr.bf16.mxu0 %v373_v1 }
  0x17   : > { %336 = vmatpush3.bf16.msra.mxu0 %v361_v5 }
  0x18   : > { %337 = vmatprep.subr.bf16.mxu0 %v373_v1 }
  0x1b   : > { %338 = vmatpush3.bf16.msra.mxu0 %v362_v6 }
  0x1c   : > { %339 = vmatprep.subr.bf16.mxu0 %v373_v1 }
  0x1f   : > { %340 = vmatpush3.bf16.msra.mxu0 %v363_v7 }
  0x20   : > { %341 = vmatprep.subr.bf16.mxu0 %v373_v1 }
  0x23   : > { %342 = vmatpush3.bf16.msra.mxu0 %v364_v8 }
  0x26   : > { %344 = vmatmul.mubr.bf16.vlgmr.msra.gmra.mrb[0].mxu0 %v140_v9 }
  0xf9   : > { %v239_v10 = vpop.f32.mrb[0].mxu0 }
  0xfa   : > { %v245_v11 = vpack.c.bf16 %v239_v10, %v239_v10  ;;  %v345_v12 = vpop.f32.mrb[1].mxu0 }
  0xfb   : > { %v242_v13 = vpop.f32.mrb[2].mxu0 }
  0xfc   : > { %247 = vst.msk [vmem:[%s138_s5] sm:$0x3] %vm246_vm1, %v245_v11  ;;  %v346_v14 = vpop.f32.mrb[3].mxu0 }
  0xfd PF: > { %s12_s9 = sadd.s32 1, %s371_s9  }
  0xfe   : > { %p9_p4 = scmp.ge.s32.totalorder %s12_s9, 4  }
 0x100   :  { %11 = sbr.rel (!%p9_p4) target bundleno = 1 (0x1), region = 58 }

// kernel: fpn_feature_expander_forward.14
= control target key start
LH: loop header
LB: loop body
LE: loop exit
PB: predicated region body
PF: predicated region fallthrough
CT: control target
= control target key end

     0   :  { %s453_s12 = smov 0   ;;  %s497_s0 = inlined_call_operand.vmem [shape: bf16[2,1,8,128], index: 0, kind: input, shape index: {}]   ;;  %s498_s1 = inlined_call_operand.vmem [shape: bf16[2,8,128], index: 1, kind: input, shape index: {}]   ;;  %s499_s2 = inlined_call_operand.vmem [shape: bf16[1,128,128], index: 2, kind: input, shape index: {}]   ;;  %s500_s3 = inlined_call_operand.vmem [shape: bf16[2,8,128], index: 3, kind: output, shape index: {}]  }
   0x1 LB: > { %s358_s13 = sadd.s32 4294967295, %s429_s12   ;;  %p362_p0 = scmp.ge.s32.totalorder %s429_s12, 1  ;;  %s429_s12 = sphi %s453_s12, %s13_s12  }
   0x2   : > { %p145_p1 = scmp.lt.s32.totalorder %s429_s12, 3 }
   0x4   : > { %p146_p2 = pnand %p362_p0, %p145_p1 }
   0x5   : > { %v415_v0 = vld [vmem:[%s499_s2] sm:$0xff] (!%p146_p2)   ;;  %v431_v1 = vmov (!%p146_p2), 0.0   ;;  %v416_v2 = vld [vmem:[%s499_s2 + $0x8] sm:$0xff] (!%p146_p2)   ;;  %vm432_vm0 = vmmov (!%p146_p2), 0   ;;  %v417_v3 = vld [vmem:[%s499_s2 + $0x10] sm:$0xff] (!%p146_p2)   ;;  %p171_p3 = scmp.lt.s32.totalorder (!%p146_p2), %s358_s13, 1 }
   0x6   : > { %149 = sbr.rel (%p146_p2) target bundleno = 255 (0xff), region = 32  ;;  %385 = vmatprep.subr.bf16.mxu0 (!%p146_p2), %v431_v1  ;;  %401 = vmatprep.mubr.msk.bf16.mxu0 (!%p146_p2), %vm432_vm0, %v431_v1  ;;  %v418_v4 = vld [vmem:[%s499_s2 + $0x18] sm:$0xff] (!%p146_p2)   ;;  %v419_v5 = vld [vmem:[%s499_s2 + $0x20] sm:$0xff] (!%p146_p2)   ;;  %v420_v6 = vld [vmem:[%s499_s2 + $0x28] sm:$0xff] (!%p146_p2)  }
   0x7   : > { %386 = vmatpush3.bf16.msra.mxu0 (!%p146_p2), %v415_v0  ;;  %v421_v7 = vld [vmem:[%s499_s2 + $0x30] sm:$0xff] (!%p146_p2)   ;;  %v422_v8 = vld [vmem:[%s499_s2 + $0x38] sm:$0xff] (!%p146_p2)  }
   0x8   : > { %387 = vmatprep.subr.bf16.mxu0 (!%p146_p2), %v431_v1 }
   0xb   : > { %388 = vmatpush3.bf16.msra.mxu0 (!%p146_p2), %v416_v2 }
   0xc   : > { %389 = vmatprep.subr.bf16.mxu0 (!%p146_p2), %v431_v1 }
   0xd   : > { %s502_s13 = smov (!%p171_p3, %s358_s13), 1 }
   0xe   : > { %s363_s28 = sshll.u32 %s502_s13, 2 }
   0xf   : > { %390 = vmatpush3.bf16.msra.mxu0 %v417_v3  ;;  %s174_s6 = scalar_lea.vmem %s497_s0, %s363_s28  ;;  %s178_s9 = scalar_lea.vmem %s498_s1, %s363_s28 }
  0x10   : > { %391 = vmatprep.subr.bf16.mxu0 %v431_v1  ;;  %v184_v9 = vld [vmem:[%s174_s6] sm:$0xf]  ;;  %s182_s13 = scalar_lea.vmem %s500_s3, %s363_s28 }
  0x11   : > { %v201_v10 = vld [vmem:[%s178_s9] sm:$0xf] }
  0x12   : > { %v202_v11 = vunpack.c.l.bf16 %v201_v10 }
  0x13   : > { %392 = vmatpush3.bf16.msra.mxu0 %v418_v4 }
  0x14   : > { %393 = vmatprep.subr.bf16.mxu0 %v431_v1 }
  0x17   : > { %394 = vmatpush3.bf16.msra.mxu0 %v419_v5 }
  0x18   : > { %395 = vmatprep.subr.bf16.mxu0 %v431_v1 }
  0x1b   : > { %396 = vmatpush3.bf16.msra.mxu0 %v420_v6 }
  0x1c   : > { %397 = vmatprep.subr.bf16.mxu0 %v431_v1 }
  0x1f   : > { %398 = vmatpush3.bf16.msra.mxu0 %v421_v7 }
  0x20   : > { %399 = vmatprep.subr.bf16.mxu0 %v431_v1 }
  0x23   : > { %400 = vmatpush3.bf16.msra.mxu0 %v422_v8 }
  0x26   : > { %402 = vmatmul.mubr.bf16.vlgmr.msra.gmra.mrb[0].mxu0 %v184_v9 }
  0xf9   : > { %v285_v12 = vpop.f32.mrb[0].mxu0 }
  0xfa   : > { %v286_v13 = vadd.f32 %v285_v12, %v202_v11  ;;  %v403_v14 = vpop.f32.mrb[1].mxu0 }
  0xfb   : > { %v288_v15 = vpop.f32.mrb[2].mxu0 }
  0xfc   : > { %v291_v16 = vpack.c.bf16 %v286_v13, %v286_v13  ;;  %v404_v17 = vpop.f32.mrb[3].mxu0 }
  0xfe   : > { %292 = vst [vmem:[%s182_s13] sm:$0xf] %v291_v16 }
  0xff PF: > { %s13_s12 = sadd.s32 1, %s429_s12  }
 0x100   : > { %p10_p4 = scmp.ge.s32.totalorder %s13_s12, 4  }
 0x102   :  { %12 = sbr.rel (!%p10_p4) target bundleno = 1 (0x1), region = 65 }

// kernel: fpn_feature_expander_forward.16
= control target key start
LH: loop header
LB: loop body
LE: loop exit
PB: predicated region body
PF: predicated region fallthrough
CT: control target
= control target key end

     0   :  { %s526_s12 = smov 0   ;;  %s598_s0 = inlined_call_operand.vmem [shape: bf16[2,1,16,128], index: 0, kind: input, shape index: {}]   ;;  %s599_s1 = inlined_call_operand.vmem [shape: bf16[2,16,256], index: 1, kind: input, shape index: {}]   ;;  %s600_s2 = inlined_call_operand.vmem [shape: bf16[1,128,256], index: 2, kind: input, shape index: {}]   ;;  %s601_s3 = inlined_call_operand.vmem [shape: bf16[2,16,256], index: 3, kind: output, shape index: {}]  }
   0x1 LB: > { %s426_s13 = sadd.s32 4294967295, %s503_s12   ;;  %p430_p0 = scmp.ge.s32.totalorder %s503_s12, 1  ;;  %s503_s12 = sphi %s526_s12, %s13_s12  }
   0x2   : > { %p147_p1 = scmp.lt.s32.totalorder %s503_s12, 3 }
   0x4   : > { %p148_p2 = pnand %p430_p0, %p147_p1 }
   0x5   : > { %v472_v0 = vld [vmem:[%s600_s2 + $0x4] ss:$8 sps:$4 sm:$0xff] (!%p148_p2)   ;;  %p176_p3 = scmp.lt.s32.totalorder (!%p148_p2), %s426_s13, 1  ;;  %v474_v1 = vld [vmem:[%s600_s2] ss:$8 sps:$4 sm:$0xff] (!%p148_p2)   ;;  %v505_v2 = vmov (!%p148_p2), 0  }
   0x6   : > { %151 = sbr.rel (%p148_p2) target bundleno = 258 (0x102), region = 32  ;;  %334 = vmatprep.mubr.bf16.mxu0 (!%p148_p2), %v505_v2  ;;  %302 = vmatprep.subr.bf16.mxu0 (!%p148_p2), %v472_v0  ;;  %v475_v3 = vld [vmem:[%s600_s2 + $0x14] ss:$8 sps:$4 sm:$0xff] (!%p148_p2)   ;;  %v477_v4 = vld [vmem:[%s600_s2 + $0x10] ss:$8 sps:$4 sm:$0xff] (!%p148_p2)  }
   0x7   : > { %303 = vmatpush1.bf16.msra.mxu0 (!%p148_p2), %v474_v1  ;;  %v478_v5 = vld [vmem:[%s600_s2 + $0x24] ss:$8 sps:$4 sm:$0xff] (!%p148_p2)   ;;  %v480_v6 = vld [vmem:[%s600_s2 + $0x20] ss:$8 sps:$4 sm:$0xff] (!%p148_p2)   ;;  %v481_v7 = vld [vmem:[%s600_s2 + $0x34] ss:$8 sps:$4 sm:$0xff] (!%p148_p2)  }
   0x8   : > { %304 = vmatprep.subr.bf16.mxu0 (!%p148_p2), %v475_v3  ;;  %v483_v8 = vld [vmem:[%s600_s2 + $0x30] ss:$8 sps:$4 sm:$0xff] (!%p148_p2)   ;;  %v484_v9 = vld [vmem:[%s600_s2 + $0x44] ss:$8 sps:$4 sm:$0xff] (!%p148_p2)   ;;  %v486_v10 = vld [vmem:[%s600_s2 + $0x40] ss:$8 sps:$4 sm:$0xff] (!%p148_p2)  }
   0x9   : > { %v487_v11 = vld [vmem:[%s600_s2 + $0x54] ss:$8 sps:$4 sm:$0xff] (!%p148_p2)   ;;  %v489_v12 = vld [vmem:[%s600_s2 + $0x50] ss:$8 sps:$4 sm:$0xff] (!%p148_p2)   ;;  %v490_v13 = vld [vmem:[%s600_s2 + $0x64] ss:$8 sps:$4 sm:$0xff] (!%p148_p2)  }
   0xa   : > { %v492_v14 = vld [vmem:[%s600_s2 + $0x60] ss:$8 sps:$4 sm:$0xff] (!%p148_p2)   ;;  %v493_v15 = vld [vmem:[%s600_s2 + $0x74] ss:$8 sps:$4 sm:$0xff] (!%p148_p2)   ;;  %v495_v16 = vld [vmem:[%s600_s2 + $0x70] ss:$8 sps:$4 sm:$0xff] (!%p148_p2)  }
   0xb   : > { %305 = vmatpush1.bf16.msra.mxu0 (!%p148_p2), %v477_v4 }
   0xc   : > { %306 = vmatprep.subr.bf16.mxu0 (!%p148_p2), %v478_v5 }
   0xd   : > { %s603_s13 = smov (!%p176_p3, %s426_s13), 1 }
   0xe   : > { %s458_s24 = sshll.u32 %s603_s13, 3  ;;  %s459_s25 = sshll.u32 %s603_s13, 4 }
   0xf   : > { %s180_s4 = scalar_lea.vmem %s598_s0, %s458_s24  ;;  %307 = vmatpush1.bf16.msra.mxu0 %v480_v6  ;;  %s185_s28 = scalar_lea.vmem %s599_s1, %s459_s25 }
  0x10   : > { %308 = vmatprep.subr.bf16.mxu0 %v481_v7  ;;  %v496_v17 = vld [vmem:[%s180_s4] sm:$0xff]   ;;  %v211_v19 = vld [vmem:[%s185_s28 + $0x8] sm:$0xff]  ;;  %s190_s4 = scalar_lea.vmem %s601_s3, %s459_s25 }
  0x11   : > { %v210_v18 = vld [vmem:[%s185_s28] sm:$0xff]  ;;  %v214_v22 = vunpack.c.l.bf16 %v211_v19  ;;  %v215_v24 = vunpack.c.h.bf16 %v211_v19 }
  0x12   : > { %v212_v20 = vunpack.c.l.bf16 %v210_v18  ;;  %v213_v21 = vunpack.c.h.bf16 %v210_v18 }
  0x13   : > { %309 = vmatpush1.bf16.msra.mxu0 %v483_v8 }
  0x14   : > { %310 = vmatprep.subr.bf16.mxu0 %v484_v9 }
  0x17   : > { %311 = vmatpush1.bf16.msra.mxu0 %v486_v10 }
  0x18   : > { %312 = vmatprep.subr.bf16.mxu0 %v487_v11 }
  0x1b   : > { %313 = vmatpush1.bf16.msra.mxu0 %v489_v12 }
  0x1c   : > { %314 = vmatprep.subr.bf16.mxu0 %v490_v13 }
  0x1f   : > { %315 = vmatpush1.bf16.msra.mxu0 %v492_v14 }
  0x20   : > { %316 = vmatprep.subr.bf16.mxu0 %v493_v15 }
  0x23   : > { %317 = vmatpush1.bf16.msra.mxu0 %v495_v16 }
  0x26   : > { %335 = vmatmul.mubr.bf16.vlgmr.msra.gmra.mrb[0].mxu0 %v496_v17 }
  0xf9   : > { %v336_v23 = vpop.f32.mrb[0].mxu0 }
  0xfa   : > { %v337_v25 = vadd.f32 %v336_v23, %v212_v20  ;;  %v338_v26 = vpop.f32.mrb[1].mxu0 }
  0xfb   : > { %v339_v27 = vadd.f32 %v338_v26, %v213_v21  ;;  %v340_v28 = vpop.f32.mrb[2].mxu0 }
  0xfc   : > { %v341_v29 = vadd.f32 %v340_v28, %v214_v22  ;;  %v342_v30 = vpop.f32.mrb[3].mxu0 }
  0xfd   : > { %v461_v31 = vpack.c.bf16 %v339_v27, %v337_v25  ;;  %v343_v32 = vadd.f32 %v342_v30, %v215_v24 }
  0xff   : > { %357 = vst [vmem:[%s190_s4] sm:$0xff] %v461_v31  ;;  %v462_v33 = vpack.c.bf16 %v343_v32, %v341_v29 }
 0x101   : > { %358 = vst [vmem:[%s190_s4 + $0x8] sm:$0xff] %v462_v33 }
 0x102 PF: > { %s13_s12 = sadd.s32 1, %s503_s12  }
 0x103   : > { %p10_p4 = scmp.ge.s32.totalorder %s13_s12, 4  }
 0x105   :  { %12 = sbr.rel (!%p10_p4) target bundleno = 1 (0x1), region = 65 }

// kernel: fpn_feature_expander_forward.17
= control target key start
LH: loop header
LB: loop body
LE: loop exit
PB: predicated region body
PF: predicated region fallthrough
CT: control target
= control target key end

     0   :  { %s1642_s9 = smov 0   ;;  %s2025_s0 = inlined_call_operand.vmem [shape: bf16[2,1,18,288], index: 0, kind: input, shape index: {}]   ;;  %s2026_s1 = inlined_call_operand.vmem [shape: bf16[3,288,256], index: 1, kind: input, shape index: {}]   ;;  %s2027_s2 = inlined_call_operand.vmem [shape: bf16[2,16,256], index: 2, kind: output, shape index: {}]  }
   0x1 LB: > { %s1215_s10 = sadd.s32 4294967295, %s1624_s9   ;;  %p1219_p0 = scmp.ge.s32.totalorder %s1624_s9, 1  ;;  %s1624_s9 = sphi %s1642_s9, %s12_s9  }
   0x2   : > { %p112_p1 = scmp.lt.s32.totalorder %s1624_s9, 3 }
   0x4   : > { %p113_p2 = pnand %p1219_p0, %p112_p1 }
   0x5   : > { %v1449_v0 = vld [vmem:[%s2026_s1 + $0x124] ss:$8 sps:$4 sm:$0xff] (!%p113_p2)   ;;  %p134_p3 = scmp.lt.s32.totalorder (!%p113_p2), %s1215_s10, 1  ;;  %v1451_v1 = vld [vmem:[%s2026_s1 + $0x120] ss:$8 sps:$4 sm:$0xff] (!%p113_p2)   ;;  %v1626_v2 = vmov (!%p113_p2), 0  }
   0x6   : > { %116 = sbr.rel (%p113_p2) target bundleno = 356 (0x164), region = 28  ;;  %543 = vmatprep.mubr.bf16.mxu0 (!%p113_p2), %v1626_v2  ;;  %468 = vmatprep.subr.bf16.mxu1 (!%p113_p2), %v1449_v0  ;;  %v1452_v3 = vld [vmem:[%s2026_s1 + $0x134] ss:$8 sps:$4 sm:$0xff] (!%p113_p2)   ;;  %v1454_v4 = vld [vmem:[%s2026_s1 + $0x130] ss:$8 sps:$4 sm:$0xff] (!%p113_p2)   ;;  %vm464_vm1 = vcmask (!%p113_p2), 261120  }
   0x7   : > { %469 = vmatpush1.bf16.msra.mxu1 (!%p113_p2), %v1451_v1  ;;  %v1455_v5 = vld [vmem:[%s2026_s1 + $0x224] ss:$8 sps:$4 sm:$0xff] (!%p113_p2)   ;;  %v1457_v6 = vld [vmem:[%s2026_s1 + $0x220] ss:$8 sps:$4 sm:$0xff] (!%p113_p2)   ;;  %v1461_v8 = vld [vmem:[%s2026_s1 + $0x234] ss:$8 sps:$4 sm:$0xff] (!%p113_p2)  }
   0x8   : > { %470 = vmatprep.subr.bf16.mxu1 (!%p113_p2), %v1452_v3  ;;  %v1458_v7 = vld [vmem:[%s2026_s1 + $0x144] ss:$8 sps:$4 sm:$0xff] (!%p113_p2)   ;;  %511 = vmatprep.subr.bf16.mxu0 (!%p113_p2), %v1455_v5  ;;  %v1463_v9 = vld [vmem:[%s2026_s1 + $0x230] ss:$8 sps:$4 sm:$0xff] (!%p113_p2)   ;;  %v1460_v10 = vld [vmem:[%s2026_s1 + $0x140] ss:$8 sps:$4 sm:$0xff] (!%p113_p2)  }
   0x9   : > { %512 = vmatpush1.bf16.msra.mxu0 (!%p113_p2), %v1457_v6  ;;  %v1464_v11 = vld [vmem:[%s2026_s1 + $0x154] ss:$8 sps:$4 sm:$0xff] (!%p113_p2)   ;;  %v1469_v12 = vld [vmem:[%s2026_s1 + $0x104] ss:$8 sps:$4 sm:$0xff] (!%p113_p2)   ;;  %v1466_v14 = vld [vmem:[%s2026_s1 + $0x150] ss:$8 sps:$4 sm:$0xff] (!%p113_p2)  }
   0xa   : > { %513 = vmatprep.subr.bf16.mxu0 (!%p113_p2), %v1461_v8  ;;  %v1472_v18 = vld [vmem:[%s2026_s1 + $0x164] ss:$8 sps:$4 sm:$0xff] (!%p113_p2)   ;;  %v1467_v20 = vld [vmem:[%s2026_s1 + $0x100] ss:$8 sps:$4 sm:$0xff] (!%p113_p2)   ;;  %vm245_vm0 = vsmask.f32 (!%p113_p2), 7424 }
   0xb   : > { %471 = vmatpush1.bf16.msra.mxu1 (!%p113_p2), %v1454_v4  ;;  %v1474_v23 = vld [vmem:[%s2026_s1 + $0x160] ss:$8 sps:$4 sm:$0xff] (!%p113_p2)   ;;  %v1478_v26 = vld [vmem:[%s2026_s1 + $0x174] ss:$8 sps:$4 sm:$0xff] (!%p113_p2)   ;;  %vm861_vm2 = vcmask (!%p113_p2), 1046528  }
   0xc   : > { %472 = vmatprep.subr.bf16.mxu1 (!%p113_p2), %v1458_v7  ;;  %v1477_v28 = vld [vmem:[%s2026_s1 + $0x114] ss:$8 sps:$4 sm:$0xff] (!%p113_p2)   ;;  %v1475_v30 = vld [vmem:[%s2026_s1 + $0x110] ss:$8 sps:$4 sm:$0xff] (!%p113_p2)   ;;  %v1484_v33 = vld [vmem:[%s2026_s1 + $0x184] ss:$8 sps:$4 sm:$0xff] (!%p113_p2)  }
   0xd   : > { %s2029_s10 = smov (!%p134_p3, %s1215_s10), 1  ;;  %514 = vmatpush1.bf16.msra.mxu0 %v1463_v9  ;;  %v1480_v32 = vld [vmem:[%s2026_s1 + $0x170] ss:$8 sps:$4 sm:$0xff]   ;;  %v1483_v34 = vld [vmem:[%s2026_s1 + $0x244] ss:$8 sps:$4 sm:$0xff]  }
   0xe   : > { %s1439_s25 = smul.u32 36, %s2029_s10  ;;  %781 = vmatprep.subr.bf16.mxu0 %v1469_v12  ;;  %v1481_v35 = vld [vmem:[%s2026_s1 + $0x240] ss:$8 sps:$4 sm:$0xff]   ;;  %v1490_v37 = vld [vmem:[%s2026_s1 + $0x194] ss:$8 sps:$4 sm:$0xff]  }
   0xf   : > { %473 = vmatpush1.bf16.msra.mxu1 %v1460_v10  ;;  %v1486_v36 = vld [vmem:[%s2026_s1 + $0x180] ss:$8 sps:$4 sm:$0xff]   ;;  %v1489_v38 = vld [vmem:[%s2026_s1 + $0x254] ss:$8 sps:$4 sm:$0xff]   ;;  %v1487_v39 = vld [vmem:[%s2026_s1 + $0x250] ss:$8 sps:$4 sm:$0xff]  }
  0x10   : > { %s1687_s6 = scalar_lea.vmem %s2025_s0, %s1439_s25  ;;  %474 = vmatprep.subr.bf16.mxu1 %v1464_v11  ;;  %v1492_v40 = vld [vmem:[%s2026_s1 + $0x190] ss:$8 sps:$4 sm:$0xff]   ;;  %v1496_v41 = vld [vmem:[%s2026_s1 + $0x1a4] ss:$8 sps:$4 sm:$0xff]   ;;  %v1493_v43 = vld [vmem:[%s2026_s1 + $0x260] ss:$8 sps:$4 sm:$0xff]  }
  0x11   : > { %v1470_v13 = vld [vmem:[%s1687_s6 + $0x8] ss:$12 sps:$4 sm:$0xff]   ;;  %v1471_v15 = vld [vmem:[%s1687_s6 + $0x20] ss:$0 sps:$4 sm:$0x11]   ;;  %s1416_s25 = sshll.u32 %s2029_s10, 4 }
  0x12   : > { %v271_v16 = vshrl.u32 %v1470_v13, 16  ;;  %v273_v17 = vshll.u32 %v1470_v13, 16  ;;  %v278_v19 = vshll.u32 %v1471_v15, 16  ;;  %v868_v24 = vrot.slane %v1470_v13, 1  ;;  %v1495_v42 = vld [vmem:[%s2026_s1 + $0x264] ss:$8 sps:$4 sm:$0xff]   ;;  %s143_s28 = scalar_lea.vmem %s2027_s2, %s1416_s25 }
  0x13   : > { %475 = vmatpush1.bf16.msra.mxu1 %v1466_v14  ;;  %v869_v27 = vrot.slane %v1471_v15, 1  ;;  %v1498_v44 = vld [vmem:[%s2026_s1 + $0x1a0] ss:$8 sps:$4 sm:$0xff]   ;;  %v1502_v45 = vld [vmem:[%s2026_s1 + $0x1b4] ss:$8 sps:$4 sm:$0xff]  }
  0x14   : > { %v275_v21 = vrot.slane %v273_v17, 1  ;;  %v280_v22 = vrot.slane %v278_v19, 1  ;;  %476 = vmatprep.subr.bf16.mxu1 %v1472_v18  ;;  %v1501_v46 = vld [vmem:[%s2026_s1 + $0x274] ss:$8 sps:$4 sm:$0xff]   ;;  %v1499_v47 = vld [vmem:[%s2026_s1 + $0x270] ss:$8 sps:$4 sm:$0xff]  }
  0x15   : > { %v1720_v31 = vsel %vm861_vm2, %v868_v24, %v869_v27  ;;  %v1504_v48 = vld [vmem:[%s2026_s1 + $0x1b0] ss:$8 sps:$4 sm:$0xff]   ;;  %v1508_v49 = vld [vmem:[%s2026_s1 + $0x1c4] ss:$8 sps:$4 sm:$0xff]   ;;  %v1505_v51 = vld [vmem:[%s2026_s1 + $0x280] ss:$8 sps:$4 sm:$0xff]  }
  0x16   : > { %v276_v25 = vor.u32 %v275_v21, %v271_v16  ;;  %v1507_v50 = vld [vmem:[%s2026_s1 + $0x284] ss:$8 sps:$4 sm:$0xff]   ;;  %v1510_v52 = vld [vmem:[%s2026_s1 + $0x1c0] ss:$8 sps:$4 sm:$0xff]   ;;  %v1514_v53 = vld [vmem:[%s2026_s1 + $0x1d4] ss:$8 sps:$4 sm:$0xff]  }
  0x17   : > { %477 = vmatpush1.bf16.msra.mxu1 %v1474_v23  ;;  %v1513_v54 = vld [vmem:[%s2026_s1 + $0x294] ss:$8 sps:$4 sm:$0xff]   ;;  %v1511_v55 = vld [vmem:[%s2026_s1 + $0x290] ss:$8 sps:$4 sm:$0xff]   ;;  %v1520_v58 = vld [vmem:[%s2026_s1 + $0x1e4] ss:$8 sps:$4 sm:$0xff]  }
  0x18   : > { %v281_v29 = vsel %vm245_vm0, %v276_v25, %v280_v22  ;;  %478 = vmatprep.subr.bf16.mxu1 %v1478_v26  ;;  %v1516_v56 = vld [vmem:[%s2026_s1 + $0x1d0] ss:$8 sps:$4 sm:$0xff]   ;;  %v1519_v61 = vld [vmem:[%s2026_s1 + $0x2a4] ss:$8 sps:$4 sm:$0xff]   ;;  %v1517_v1 = vld [vmem:[%s2026_s1 + $0x2a0] ss:$8 sps:$4 sm:$0xff]  }
  0x19   : > { %1301 = vmatmul.mubr.msk.bf16.vlgmr.msra.gmra.mrb[0].mxu0 %vm464_vm1, %v281_v29  ;;  %v149_v57 = vld [vmem:[%s1687_s6 + $0x18] sm:$0x11]  ;;  %v1805_v59 = vld [vmem:[%s1687_s6 + $0x4] ss:$12 sps:$4 sm:$0xff]   ;;  %v1522_v3 = vld [vmem:[%s2026_s1 + $0x1e0] ss:$8 sps:$4 sm:$0xff]  }
  0x1a   : > { %782 = vmatpush1.bf16.msra.mxu0 %v1467_v20  ;;  %813 = vmatprep.mubr.bf16.mxu0 %v1626_v2  ;;  %v1263_v60 = vcombine.high %v149_v57, %v149_v57  ;;  %v259_v62 = vshrl.u32 %v1805_v59, 16  ;;  %v261_v63 = vshll.u32 %v1805_v59, 16  ;;  %v1819_v4 = vld [vmem:[%s1687_s6] ss:$12 sps:$4 sm:$0xff]   ;;  %v1526_v5 = vld [vmem:[%s2026_s1 + $0x1f4] ss:$8 sps:$4 sm:$0xff]  }
  0x1b   : > { %783 = vmatprep.subr.bf16.mxu0 %v1477_v28  ;;  %479 = vmatpush1.bf16.msra.mxu1 %v1480_v32  ;;  %v1525_v8 = vld [vmem:[%s2026_s1 + $0x2b4] ss:$8 sps:$4 sm:$0xff]   ;;  %v1523_v9 = vld [vmem:[%s2026_s1 + $0x2b0] ss:$8 sps:$4 sm:$0xff]   ;;  %v865_v11 = vrot.slane %v1805_v59, 1  ;;  %v249_v14 = vshll.u32 %v1819_v4, 16 }
  0x1c   : > { %480 = vmatprep.subr.bf16.mxu1 %v1484_v33  ;;  %v266_v0 = vshll.u32 %v1263_v60, 16  ;;  %v263_v6 = vrot.slane %v261_v63, 1  ;;  %v1528_v12 = vld [vmem:[%s2026_s1 + $0x1f0] ss:$8 sps:$4 sm:$0xff]   ;;  %v866_v15 = vrot.slane %v1263_v60, 1  ;;  %v247_v22 = vshrl.u32 %v1819_v4, 16 }
  0x1d   : > { %v1532_v16 = vld [vmem:[%s2026_s1 + $0x204] ss:$8 sps:$4 sm:$0xff]   ;;  %v1529_v20 = vld [vmem:[%s2026_s1 + $0x2c0] ss:$8 sps:$4 sm:$0xff]   ;;  %v251_v23 = vrot.slane %v249_v14, 1 }
  0x1e   : > { %784 = vmatpush1.bf16.msra.mxu0 %v1475_v30  ;;  %v268_v7 = vrot.slane %v266_v0, 1  ;;  %v264_v10 = vor.u32 %v263_v6, %v259_v62  ;;  %v1531_v18 = vld [vmem:[%s2026_s1 + $0x2c4] ss:$8 sps:$4 sm:$0xff]   ;;  %v867_v19 = vsel %vm861_vm2, %v865_v11, %v866_v15  ;;  %v1534_v21 = vld [vmem:[%s2026_s1 + $0x200] ss:$8 sps:$4 sm:$0xff]  }
  0x1f   : > { %1056 = vmatprep.subr.bf16.mxu0 %v1483_v34  ;;  %481 = vmatpush1.bf16.msra.mxu1 %v1486_v36  ;;  %v1538_v25 = vld [vmem:[%s2026_s1 + $0x214] ss:$8 sps:$4 sm:$0xff]   ;;  %v1535_v27 = vld [vmem:[%s2026_s1 + $0x2d0] ss:$8 sps:$4 sm:$0xff]   ;;  %v252_v29 = vor.u32 %v251_v23, %v247_v22  ;;  %v1551_v32 = vld [vmem:[%s2026_s1 + $0x4] ss:$8 sps:$4 sm:$0xff]  }
  0x20   : > { %482 = vmatprep.subr.bf16.mxu1 %v1490_v37  ;;  %v269_v17 = vsel %vm245_vm0, %v264_v10, %v268_v7  ;;  %v1537_v26 = vld [vmem:[%s2026_s1 + $0x2d4] ss:$8 sps:$4 sm:$0xff]   ;;  %v1540_v28 = vld [vmem:[%s2026_s1 + $0x210] ss:$8 sps:$4 sm:$0xff]   ;;  %v1543_v33 = vld [vmem:[%s2026_s1 + $0x2e4] ss:$8 sps:$4 sm:$0xff]  }
  0x21   : > { %1338 = vmatmul.mubr.msk.bf16.vlgmr.msra.gmra.mrb[4].mxu0 %vm464_vm1, %v1470_v13  ;;  %v1834_v13 = vcombine.low %v149_v57, %v149_v57  ;;  %500 = vmatprep.mubr.bf16.mxu1 %v269_v17  ;;  %v1541_v34 = vld [vmem:[%s2026_s1 + $0x2e0] ss:$8 sps:$4 sm:$0xff]   ;;  %v1557_v37 = vld [vmem:[%s2026_s1 + $0x14] ss:$8 sps:$4 sm:$0xff]   ;;  %v862_v57 = vrot.slane %v1819_v4, 1 }
  0x22   : > { %1057 = vmatpush1.bf16.msra.mxu0 %v1481_v35  ;;  %1088 = vmatprep.mubr.bf16.mxu0 %v867_v19  ;;  %v1549_v36 = vld [vmem:[%s2026_s1] ss:$8 sps:$4 sm:$0xff]   ;;  %v1587_v60 = vld [vmem:[%s2026_s1 + $0x344] ss:$8 sps:$4 sm:$0xff]   ;;  %v1590_v0 = vld [vmem:[%s2026_s1 + $0x74] ss:$8 sps:$4 sm:$0xff]  }
  0x23   : > { %1058 = vmatprep.subr.bf16.mxu0 %v1489_v38  ;;  %483 = vmatpush1.bf16.msra.mxu1 %v1492_v40  ;;  %v254_v24 = vshll.u32 %v1834_v13, 16  ;;  %v1554_v38 = vld [vmem:[%s2026_s1 + $0x2f4] ss:$8 sps:$4 sm:$0xff]   ;;  %v1555_v40 = vld [vmem:[%s2026_s1 + $0x10] ss:$8 sps:$4 sm:$0xff]  }
  0x24   : > { %484 = vmatprep.subr.bf16.mxu1 %v1496_v41  ;;  %v1563_v41 = vld [vmem:[%s2026_s1 + $0x24] ss:$8 sps:$4 sm:$0xff]   ;;  %v1585_v63 = vld [vmem:[%s2026_s1 + $0x340] ss:$8 sps:$4 sm:$0xff]   ;;  %v1605_v11 = vld [vmem:[%s2026_s1 + $0xb4] ss:$8 sps:$4 sm:$0xff]  }
  0x25   : > { %v256_v30 = vrot.slane %v254_v24, 1  ;;  %v1596_v6 = vld [vmem:[%s2026_s1 + $0x84] ss:$8 sps:$4 sm:$0xff]   ;;  %v1594_v7 = vld [vmem:[%s2026_s1 + $0x80] ss:$8 sps:$4 sm:$0xff]  }
  0x26   : > { %1059 = vmatpush1.bf16.msra.mxu0 %v1487_v39  ;;  %v1552_v39 = vld [vmem:[%s2026_s1 + $0x2f0] ss:$8 sps:$4 sm:$0xff]   ;;  %v1600_v10 = vld [vmem:[%s2026_s1 + $0xa0] ss:$8 sps:$4 sm:$0xff]   ;;  %v1611_v14 = vld [vmem:[%s2026_s1 + $0xd4] ss:$8 sps:$4 sm:$0xff]  }
  0x27   : > { %1060 = vmatprep.subr.bf16.mxu0 %v1495_v42  ;;  %485 = vmatpush1.bf16.msra.mxu1 %v1498_v44  ;;  %v257_v35 = vsel %vm245_vm0, %v252_v29, %v256_v30  ;;  %v1560_v42 = vld [vmem:[%s2026_s1 + $0x304] ss:$8 sps:$4 sm:$0xff]   ;;  %v1561_v44 = vld [vmem:[%s2026_s1 + $0x20] ss:$8 sps:$4 sm:$0xff]   ;;  %v1609_v15 = vld [vmem:[%s2026_s1 + $0xd0] ss:$8 sps:$4 sm:$0xff]  }
  0x28   : > { %486 = vmatprep.subr.bf16.mxu1 %v1502_v45  ;;  %v1569_v45 = vld [vmem:[%s2026_s1 + $0x34] ss:$8 sps:$4 sm:$0xff]   ;;  %v1612_v17 = vld [vmem:[%s2026_s1 + $0xe0] ss:$8 sps:$4 sm:$0xff]   ;;  %v1615_v19 = vld [vmem:[%s2026_s1 + $0xf0] ss:$8 sps:$4 sm:$0xff]  }
  0x2a   : > { %1061 = vmatpush1.bf16.msra.mxu0 %v1493_v43  ;;  %v1558_v43 = vld [vmem:[%s2026_s1 + $0x300] ss:$8 sps:$4 sm:$0xff]  }
  0x2b   : > { %1062 = vmatprep.subr.bf16.mxu0 %v1501_v46  ;;  %487 = vmatpush1.bf16.msra.mxu1 %v1504_v48  ;;  %v1566_v46 = vld [vmem:[%s2026_s1 + $0x314] ss:$8 sps:$4 sm:$0xff]   ;;  %v1564_v48 = vld [vmem:[%s2026_s1 + $0x310] ss:$8 sps:$4 sm:$0xff]  }
  0x2c   : > { %488 = vmatprep.subr.bf16.mxu1 %v1508_v49  ;;  %v1575_v49 = vld [vmem:[%s2026_s1 + $0x44] ss:$8 sps:$4 sm:$0xff]  }
  0x2e   : > { %1063 = vmatpush1.bf16.msra.mxu0 %v1499_v47  ;;  %v1567_v47 = vld [vmem:[%s2026_s1 + $0x30] ss:$8 sps:$4 sm:$0xff]  }
  0x2f   : > { %1064 = vmatprep.subr.bf16.mxu0 %v1507_v50  ;;  %489 = vmatpush1.bf16.msra.mxu1 %v1510_v52  ;;  %v1572_v50 = vld [vmem:[%s2026_s1 + $0x324] ss:$8 sps:$4 sm:$0xff]   ;;  %v1570_v52 = vld [vmem:[%s2026_s1 + $0x320] ss:$8 sps:$4 sm:$0xff]  }
  0x30   : > { %490 = vmatprep.subr.bf16.mxu1 %v1514_v53  ;;  %v1581_v53 = vld [vmem:[%s2026_s1 + $0x54] ss:$8 sps:$4 sm:$0xff]  }
  0x32   : > { %1065 = vmatpush1.bf16.msra.mxu0 %v1505_v51  ;;  %v1573_v51 = vld [vmem:[%s2026_s1 + $0x40] ss:$8 sps:$4 sm:$0xff]  }
  0x33   : > { %1066 = vmatprep.subr.bf16.mxu0 %v1513_v54  ;;  %491 = vmatpush1.bf16.msra.mxu1 %v1516_v56  ;;  %v1578_v54 = vld [vmem:[%s2026_s1 + $0x334] ss:$8 sps:$4 sm:$0xff]   ;;  %v1576_v56 = vld [vmem:[%s2026_s1 + $0x330] ss:$8 sps:$4 sm:$0xff]  }
  0x34   : > { %492 = vmatprep.subr.bf16.mxu1 %v1520_v58  ;;  %v863_v58 = vrot.slane %v1834_v13, 1  ;;  %v1606_v13 = vld [vmem:[%s2026_s1 + $0xc0] ss:$8 sps:$4 sm:$0xff]  }
  0x36   : > { %1067 = vmatpush1.bf16.msra.mxu0 %v1511_v55  ;;  %v1579_v55 = vld [vmem:[%s2026_s1 + $0x50] ss:$8 sps:$4 sm:$0xff]   ;;  %v864_v62 = vsel %vm861_vm2, %v862_v57, %v863_v58 }
  0x37   : > { %1068 = vmatprep.subr.bf16.mxu0 %v1519_v61  ;;  %493 = vmatpush1.bf16.msra.mxu1 %v1522_v3  ;;  %v1582_v61 = vld [vmem:[%s2026_s1 + $0x60] ss:$8 sps:$4 sm:$0xff]   ;;  %v1588_v3 = vld [vmem:[%s2026_s1 + $0x70] ss:$8 sps:$4 sm:$0xff]  }
  0x38   : > { %494 = vmatprep.subr.bf16.mxu1 %v1526_v5  ;;  %v1591_v5 = vld [vmem:[%s2026_s1 + $0x350] ss:$8 sps:$4 sm:$0xff]  }
  0x3a   : > { %1069 = vmatpush1.bf16.msra.mxu0 %v1517_v1  ;;  %v1593_v1 = vld [vmem:[%s2026_s1 + $0x354] ss:$8 sps:$4 sm:$0xff]  }
  0x3b   : > { %1070 = vmatprep.subr.bf16.mxu0 %v1525_v8  ;;  %495 = vmatpush1.bf16.msra.mxu1 %v1528_v12  ;;  %v1599_v8 = vld [vmem:[%s2026_s1 + $0x94] ss:$8 sps:$4 sm:$0xff]   ;;  %v1603_v12 = vld [vmem:[%s2026_s1 + $0xb0] ss:$8 sps:$4 sm:$0xff]  }
  0x3c   : > { %496 = vmatprep.subr.bf16.mxu1 %v1532_v16  ;;  %v1614_v16 = vld [vmem:[%s2026_s1 + $0xe4] ss:$8 sps:$4 sm:$0xff]  }
  0x3e   : > { %1071 = vmatpush1.bf16.msra.mxu0 %v1523_v9  ;;  %v1597_v9 = vld [vmem:[%s2026_s1 + $0x90] ss:$8 sps:$4 sm:$0xff]  }
  0x3f   : > { %1072 = vmatprep.subr.bf16.mxu0 %v1531_v18  ;;  %497 = vmatpush1.bf16.msra.mxu1 %v1534_v21  ;;  %v1617_v18 = vld [vmem:[%s2026_s1 + $0xf4] ss:$8 sps:$4 sm:$0xff]  }
  0x40   : > { %498 = vmatprep.subr.bf16.mxu1 %v1538_v25 }
  0x42   : > { %1073 = vmatpush1.bf16.msra.mxu0 %v1529_v20 }
  0x43   : > { %1074 = vmatprep.subr.bf16.mxu0 %v1537_v26  ;;  %499 = vmatpush1.bf16.msra.mxu1 %v1540_v28 }
  0x44   : > { %738 = vmatprep.subr.bf16.mxu1 %v1551_v32 }
  0x46   : > { %1075 = vmatpush1.bf16.msra.mxu0 %v1535_v27  ;;  %501 = vmatmul.mubr.bf16.vlgmr.msra.gmra.mrb[0].mxu1 %v257_v35 }
  0x47   : > { %1076 = vmatprep.subr.bf16.mxu0 %v1543_v33  ;;  %739 = vmatpush1.bf16.msra.mxu1 %v1549_v36 }
  0x48   : > { %770 = vmatprep.mubr.bf16.mxu1 %v1805_v59  ;;  %740 = vmatprep.subr.bf16.mxu1 %v1557_v37  ;;  %v1584_v59 = vld [vmem:[%s2026_s1 + $0x64] ss:$8 sps:$4 sm:$0xff]  }
  0x4a   : > { %1077 = vmatpush1.bf16.msra.mxu0 %v1541_v34 }
  0x4b   : > { %1078 = vmatprep.subr.bf16.mxu0 %v1554_v38  ;;  %741 = vmatpush1.bf16.msra.mxu1 %v1555_v40 }
  0x4c   : > { %742 = vmatprep.subr.bf16.mxu1 %v1563_v41 }
  0x4e   : > { %1079 = vmatpush1.bf16.msra.mxu0 %v1552_v39 }
  0x4f   : > { %1080 = vmatprep.subr.bf16.mxu0 %v1560_v42  ;;  %743 = vmatpush1.bf16.msra.mxu1 %v1561_v44 }
  0x50   : > { %744 = vmatprep.subr.bf16.mxu1 %v1569_v45 }
  0x52   : > { %1081 = vmatpush1.bf16.msra.mxu0 %v1558_v43 }
  0x53   : > { %1082 = vmatprep.subr.bf16.mxu0 %v1566_v46  ;;  %745 = vmatpush1.bf16.msra.mxu1 %v1567_v47 }
  0x54   : > { %746 = vmatprep.subr.bf16.mxu1 %v1575_v49 }
  0x56   : > { %1083 = vmatpush1.bf16.msra.mxu0 %v1564_v48 }
  0x57   : > { %1084 = vmatprep.subr.bf16.mxu0 %v1572_v50  ;;  %747 = vmatpush1.bf16.msra.mxu1 %v1573_v51 }
  0x58   : > { %748 = vmatprep.subr.bf16.mxu1 %v1581_v53 }
  0x5a   : > { %1085 = vmatpush1.bf16.msra.mxu0 %v1570_v52 }
  0x5b   : > { %1086 = vmatprep.subr.bf16.mxu0 %v1578_v54  ;;  %749 = vmatpush1.bf16.msra.mxu1 %v1579_v55 }
  0x5c   : > { %750 = vmatprep.subr.bf16.mxu1 %v1584_v59 }
  0x5e   : > { %1087 = vmatpush1.bf16.msra.mxu0 %v1576_v56 }
  0x5f   : > { %1099 = vmatprep.subr.bf16.mxu0 %v1587_v60  ;;  %751 = vmatpush1.bf16.msra.mxu1 %v1582_v61 }
  0x60   : > { %752 = vmatprep.subr.bf16.mxu1 %v1590_v0 }
  0x61   : > { %1089 = vmatmul.mubr.bf16.vlgmr.msra.gmra.mrb[4].mxu0 %v864_v62 }
  0x62   : > { %1100 = vmatpush1.bf16.msra.mxu0 %v1585_v63  ;;  %1131 = vmatprep.mubr.bf16.mxu0 %v1626_v2  ;;  %v1602_v2 = vld [vmem:[%s2026_s1 + $0xa4] ss:$8 sps:$4 sm:$0xff]  }
  0x63   : > { %1101 = vmatprep.subr.bf16.mxu0 %v1593_v1  ;;  %753 = vmatpush1.bf16.msra.mxu1 %v1588_v3 }
  0x64   : > { %754 = vmatprep.subr.bf16.mxu1 %v1596_v6 }
  0x66   : > { %1102 = vmatpush1.bf16.msra.mxu0 %v1591_v5 }
  0x67   : > { %755 = vmatpush1.bf16.msra.mxu1 %v1594_v7 }
  0x68   : > { %756 = vmatprep.subr.bf16.mxu1 %v1599_v8 }
  0x6b   : > { %757 = vmatpush1.bf16.msra.mxu1 %v1597_v9 }
  0x6c   : > { %758 = vmatprep.subr.bf16.mxu1 %v1602_v2 }
  0x6d   : > { %1411 = vmatmul.mubr.msk.bf16.vlgmr.msra.gmra.mrb[4].mxu0 %vm464_vm1, %v1720_v31  ;;  %v1608_v31 = vld [vmem:[%s2026_s1 + $0xc4] ss:$8 sps:$4 sm:$0xff]  }
  0x6f   : > { %759 = vmatpush1.bf16.msra.mxu1 %v1600_v10 }
  0x70   : > { %760 = vmatprep.subr.bf16.mxu1 %v1605_v11 }
  0x73   : > { %761 = vmatpush1.bf16.msra.mxu1 %v1603_v12 }
  0x74   : > { %762 = vmatprep.subr.bf16.mxu1 %v1608_v31 }
  0x77   : > { %763 = vmatpush1.bf16.msra.mxu1 %v1606_v13 }
  0x78   : > { %764 = vmatprep.subr.bf16.mxu1 %v1611_v14 }
  0x7b   : > { %765 = vmatpush1.bf16.msra.mxu1 %v1609_v15 }
  0x7c   : > { %766 = vmatprep.subr.bf16.mxu1 %v1614_v16 }
  0x7f   : > { %767 = vmatpush1.bf16.msra.mxu1 %v1612_v17 }
  0x80   : > { %768 = vmatprep.subr.bf16.mxu1 %v1617_v18 }
  0x83   : > { %769 = vmatpush1.bf16.msra.mxu1 %v1615_v19 }
  0x86   : > { %771 = vmatmul.mubr.bf16.vlgmr.msra.gmra.mrb[4].mxu1 %v1819_v4 }
  0xec   : > { %v545_v20 = vpop.f32.mrb[0].mxu0 }
  0xed   : > { %v547_v21 = vpop.f32.mrb[1].mxu0 }
  0xee   : > { %v549_v22 = vpop.f32.mrb[2].mxu0 }
  0xef   : > { %v551_v23 = vpop.f32.mrb[3].mxu0 }
 0x119   : > { %v502_v24 = vpop.f32.mrb[0].mxu1 }
 0x11a   : > { %v546_v25 = vadd.f32 %v545_v20, %v502_v24  ;;  %v504_v26 = vpop.f32.mrb[1].mxu1 }
 0x11b   : > { %v548_v27 = vadd.f32 %v547_v21, %v504_v26  ;;  %v506_v28 = vpop.f32.mrb[2].mxu1 }
 0x11c   : > { %v550_v29 = vadd.f32 %v549_v22, %v506_v28  ;;  %v508_v30 = vpop.f32.mrb[3].mxu1 }
 0x11d   : > { %v552_v32 = vadd.f32 %v551_v23, %v508_v30 }
 0x140   : > { %v1133_v33 = vpop.f32.mrb[4].mxu0 }
 0x141   : > { %v1135_v34 = vpop.f32.mrb[5].mxu0 }
 0x142   : > { %v1137_v35 = vpop.f32.mrb[6].mxu0 }
 0x143   : > { %v1139_v36 = vpop.f32.mrb[7].mxu0 }
 0x159   : > { %v772_v37 = vpop.f32.mrb[4].mxu1 }
 0x15a   : > { %v773_v38 = vadd.f32 %v772_v37, %v546_v25  ;;  %v774_v4 = vpop.f32.mrb[5].mxu1 }
 0x15b   : > { %v775_v39 = vadd.f32 %v774_v4, %v548_v27  ;;  %v776_v40 = vpop.f32.mrb[6].mxu1 }
 0x15c   : > { %v1421_v41 = vadd.f32 %v1133_v33, %v773_v38  ;;  %v777_v42 = vadd.f32 %v776_v40, %v550_v29  ;;  %v778_v43 = vpop.f32.mrb[7].mxu1 }
 0x15d   : > { %v1424_v44 = vadd.f32 %v1135_v34, %v775_v39  ;;  %v779_v45 = vadd.f32 %v778_v43, %v552_v32 }
 0x15e   : > { %v1427_v46 = vadd.f32 %v1137_v35, %v777_v42 }
 0x15f   : > { %v1417_v47 = vpack.c.bf16 %v1424_v44, %v1421_v41  ;;  %v1430_v48 = vadd.f32 %v1139_v36, %v779_v45 }
 0x161   : > { %1158 = vst [vmem:[%s143_s28] sm:$0xff] %v1417_v47  ;;  %v1418_v49 = vpack.c.bf16 %v1430_v48, %v1427_v46 }
 0x163   : > { %1159 = vst [vmem:[%s143_s28 + $0x8] sm:$0xff] %v1418_v49 }
 0x164 PF: > { %s12_s9 = sadd.s32 1, %s1624_s9  }
 0x165   : > { %p9_p4 = scmp.ge.s32.totalorder %s12_s9, 4  }
 0x167   :  { %11 = sbr.rel (!%p9_p4) target bundleno = 1 (0x1), region = 60 }

// kernel: fpn_feature_expander_forward.15
= control target key start
LH: loop header
LB: loop body
LE: loop exit
PB: predicated region body
PF: predicated region fallthrough
CT: control target
= control target key end

     0   :  { %s762_s9 = smov 0   ;;  %s906_s0 = inlined_call_operand.vmem [shape: bf16[2,1,10,160], index: 0, kind: input, shape index: {}]   ;;  %s907_s1 = inlined_call_operand.vmem [shape: bf16[3,160,128], index: 1, kind: input, shape index: {}]   ;;  %s908_s2 = inlined_call_operand.vmem [shape: bf16[2,8,128], index: 2, kind: output, shape index: {}]  }
   0x1 LB: > { %s602_s10 = sadd.s32 4294967295, %s744_s9   ;;  %p606_p0 = scmp.ge.s32.totalorder %s744_s9, 1  ;;  %s744_s9 = sphi %s762_s9, %s12_s9  }
   0x2   : > { %p112_p1 = scmp.lt.s32.totalorder %s744_s9, 3 }
   0x4   : > { %p113_p2 = pnand %p606_p0, %p112_p1 }
   0x5   : > { %v704_v0 = vld [vmem:[%s907_s1] sm:$0xff] (!%p113_p2)   ;;  %v746_v1 = vmov (!%p113_p2), 0   ;;  %p133_p3 = scmp.lt.s32.totalorder (!%p113_p2), %s602_s10, 1  ;;  %v705_v2 = vld [vmem:[%s907_s1 + $0x8] sm:$0xff] (!%p113_p2)   ;;  %v706_v3 = vld [vmem:[%s907_s1 + $0x10] sm:$0xff] (!%p113_p2)   ;;  %vm269_vm0 = vcmask (!%p113_p2), 261120  }
   0x6   : > { %116 = sbr.rel (%p113_p2) target bundleno = 303 (0x12f), region = 28  ;;  %379 = vmatprep.subr.bf16.mxu0 (!%p113_p2), %v746_v1  ;;  %273 = vmatprep.subr.bf16.mxu1 (!%p113_p2), %v746_v1  ;;  %v707_v4 = vld [vmem:[%s907_s1 + $0x18] sm:$0xff] (!%p113_p2)   ;;  %v714_v5 = vld [vmem:[%s907_s1 + $0x50] sm:$0xff] (!%p113_p2)   ;;  %v708_v11 = vld [vmem:[%s907_s1 + $0x20] sm:$0xff] (!%p113_p2)  }
   0x7   : > { %380 = vmatpush1.bf16.msra.mxu0 (!%p113_p2), %v704_v0  ;;  %274 = vmatpush1.bf16.msra.mxu1 (!%p113_p2), %v714_v5  ;;  %v719_v10 = vld [vmem:[%s907_s1 + $0x58] sm:$0xff] (!%p113_p2)   ;;  %v721_v14 = vld [vmem:[%s907_s1 + $0x60] sm:$0xff] (!%p113_p2)   ;;  %v709_v16 = vld [vmem:[%s907_s1 + $0x28] sm:$0xff] (!%p113_p2)  }
   0x8   : > { %381 = vmatprep.subr.bf16.mxu0 (!%p113_p2), %v746_v1  ;;  %275 = vmatprep.subr.bf16.mxu1 (!%p113_p2), %v746_v1  ;;  %v723_v18 = vld [vmem:[%s907_s1 + $0x68] sm:$0xff] (!%p113_p2)   ;;  %v710_v19 = vld [vmem:[%s907_s1 + $0x30] sm:$0xff] (!%p113_p2)   ;;  %v711_v21 = vld [vmem:[%s907_s1 + $0x38] sm:$0xff] (!%p113_p2)  }
   0x9   : > { %v725_v20 = vld [vmem:[%s907_s1 + $0x70] sm:$0xff] (!%p113_p2)   ;;  %v727_v22 = vld [vmem:[%s907_s1 + $0x78] sm:$0xff] (!%p113_p2)   ;;  %v712_v23 = vld [vmem:[%s907_s1 + $0x40] sm:$0xff] (!%p113_p2)  }
   0xa   : > { %v729_v24 = vld [vmem:[%s907_s1 + $0x80] sm:$0xff] (!%p113_p2)   ;;  %v713_v25 = vld [vmem:[%s907_s1 + $0x48] sm:$0xff] (!%p113_p2)   ;;  %v733_v32 = vld [vmem:[%s907_s1 + $0x90] sm:$0xff] (!%p113_p2)  }
   0xb   : > { %382 = vmatpush1.bf16.msra.mxu0 (!%p113_p2), %v705_v2  ;;  %276 = vmatpush1.bf16.msra.mxu1 (!%p113_p2), %v719_v10  ;;  %v731_v27 = vld [vmem:[%s907_s1 + $0x88] sm:$0xff] (!%p113_p2)   ;;  %v718_v29 = vld [vmem:[%s907_s1 + $0xa0] sm:$0xff] (!%p113_p2)   ;;  %v735_v36 = vld [vmem:[%s907_s1 + $0x98] sm:$0xff] (!%p113_p2)  }
   0xc   : > { %383 = vmatprep.subr.bf16.mxu0 (!%p113_p2), %v746_v1  ;;  %277 = vmatprep.subr.bf16.mxu1 (!%p113_p2), %v746_v1  ;;  %v720_v33 = vld [vmem:[%s907_s1 + $0xa8] sm:$0xff] (!%p113_p2)   ;;  %v722_v37 = vld [vmem:[%s907_s1 + $0xb0] sm:$0xff] (!%p113_p2)   ;;  %v724_v39 = vld [vmem:[%s907_s1 + $0xb8] sm:$0xff] (!%p113_p2)  }
   0xd   : > { %s910_s10 = smov (!%p133_p3, %s602_s10), 1  ;;  %v726_v40 = vld [vmem:[%s907_s1 + $0xc0] sm:$0xff]   ;;  %v728_v41 = vld [vmem:[%s907_s1 + $0xc8] sm:$0xff]   ;;  %v730_v42 = vld [vmem:[%s907_s1 + $0xd0] sm:$0xff]  }
   0xe   : > { %s689_s15 = sshll.u32 %s910_s10, 4  ;;  %v732_v43 = vld [vmem:[%s907_s1 + $0xd8] sm:$0xff]   ;;  %v734_v44 = vld [vmem:[%s907_s1 + $0xe0] sm:$0xff]   ;;  %v737_v45 = vld [vmem:[%s907_s1 + $0xe8] sm:$0xff]   ;;  %s609_s23 = sshll.u32 %s910_s10, 2 }
   0xf   : > { %s137_s20 = scalar_lea.vmem %s906_s0, %s689_s15  ;;  %384 = vmatpush1.bf16.msra.mxu0 %v706_v3  ;;  %278 = vmatpush1.bf16.msra.mxu1 %v721_v14  ;;  %s141_s26 = scalar_lea.vmem %s908_s2, %s609_s23 }
  0x10   : > { %385 = vmatprep.subr.bf16.mxu0 %v746_v1  ;;  %v143_v6 = vld [vmem:[%s137_s20] sm:$0xff]  ;;  %v144_v7 = vld [vmem:[%s137_s20 + $0x8] sm:$0x11]  ;;  %279 = vmatprep.subr.bf16.mxu1 %v746_v1 }
  0x11   : > { %v644_v8 = vcombine.high %v143_v6, %v143_v6  ;;  %v631_v9 = vcombine.high %v143_v6, %v144_v7  ;;  %v630_v26 = vcombine.low %v143_v6, %v144_v7  ;;  %v643_v28 = vcombine.low %v143_v6, %v143_v6 }
  0x13   : > { %386 = vmatpush1.bf16.msra.mxu0 %v707_v4  ;;  %655 = vmatprep.mubr.msk.bf16.mxu0 %vm269_vm0, %v644_v8  ;;  %v202_v12 = vshrl.u32 %v631_v9, 16  ;;  %v204_v13 = vshll.u32 %v631_v9, 16  ;;  %v441_v30 = vrot.slane %v631_v9, 1  ;;  %v197_v31 = vshll.u32 %v630_v26, 16 }
  0x14   : > { %387 = vmatprep.subr.bf16.mxu0 %v746_v1  ;;  %280 = vmatpush1.bf16.msra.mxu1 %v723_v18  ;;  %v195_v34 = vshrl.u32 %v630_v26, 16  ;;  %v440_v46 = vrot.slane %v630_v26, 1 }
  0x15   : > { %v206_v15 = vrot.slane %v204_v13, 1  ;;  %281 = vmatprep.subr.bf16.mxu1 %v746_v1  ;;  %v199_v35 = vrot.slane %v197_v31, 1 }
  0x17   : > { %388 = vmatpush1.bf16.msra.mxu0 %v708_v11  ;;  %v207_v17 = vor.u32 %v206_v15, %v202_v12  ;;  %v200_v38 = vor.u32 %v199_v35, %v195_v34 }
  0x18   : > { %389 = vmatprep.subr.bf16.mxu0 %v746_v1  ;;  %282 = vmatpush1.bf16.msra.mxu1 %v725_v20 }
  0x19   : > { %642 = vmatprep.mubr.msk.bf16.mxu1 %vm269_vm0, %v207_v17  ;;  %283 = vmatprep.subr.bf16.mxu1 %v746_v1 }
  0x1b   : > { %390 = vmatpush1.bf16.msra.mxu0 %v709_v16 }
  0x1c   : > { %391 = vmatprep.subr.bf16.mxu0 %v746_v1  ;;  %284 = vmatpush1.bf16.msra.mxu1 %v727_v22 }
  0x1d   : > { %285 = vmatprep.subr.bf16.mxu1 %v746_v1 }
  0x1f   : > { %392 = vmatpush1.bf16.msra.mxu0 %v710_v19 }
  0x20   : > { %393 = vmatprep.subr.bf16.mxu0 %v746_v1  ;;  %286 = vmatpush1.bf16.msra.mxu1 %v729_v24 }
  0x21   : > { %287 = vmatprep.subr.bf16.mxu1 %v746_v1 }
  0x23   : > { %394 = vmatpush1.bf16.msra.mxu0 %v711_v21 }
  0x24   : > { %395 = vmatprep.subr.bf16.mxu0 %v746_v1  ;;  %288 = vmatpush1.bf16.msra.mxu1 %v731_v27 }
  0x25   : > { %289 = vmatprep.subr.bf16.mxu1 %v746_v1 }
  0x27   : > { %396 = vmatpush1.bf16.msra.mxu0 %v712_v23 }
  0x28   : > { %397 = vmatprep.subr.bf16.mxu0 %v746_v1  ;;  %290 = vmatpush1.bf16.msra.mxu1 %v733_v32 }
  0x29   : > { %291 = vmatprep.subr.bf16.mxu1 %v746_v1 }
  0x2b   : > { %398 = vmatpush1.bf16.msra.mxu0 %v713_v25 }
  0x2c   : > { %506 = vmatprep.subr.bf16.mxu0 %v746_v1  ;;  %292 = vmatpush1.bf16.msra.mxu1 %v735_v36 }
  0x2e   : > { %412 = vmatmul.mubr.bf16.vlgmr.msra.gmra.mrb[0].mxu0 %v643_v28 }
  0x2f   : > { %507 = vmatpush1.bf16.msra.mxu0 %v718_v29  ;;  %686 = vmatprep.mubr.msk.bf16.mxu0 %vm269_vm0, %v441_v30 }
  0x30   : > { %508 = vmatprep.subr.bf16.mxu0 %v746_v1  ;;  %306 = vmatmul.mubr.bf16.vlgmr.msra.gmra.mrb[0].mxu1 %v200_v38 }
  0x33   : > { %509 = vmatpush1.bf16.msra.mxu0 %v720_v33 }
  0x34   : > { %510 = vmatprep.subr.bf16.mxu0 %v746_v1 }
  0x37   : > { %511 = vmatpush1.bf16.msra.mxu0 %v722_v37 }
  0x38   : > { %512 = vmatprep.subr.bf16.mxu0 %v746_v1 }
  0x3b   : > { %513 = vmatpush1.bf16.msra.mxu0 %v724_v39 }
  0x3c   : > { %514 = vmatprep.subr.bf16.mxu0 %v746_v1 }
  0x3f   : > { %515 = vmatpush1.bf16.msra.mxu0 %v726_v40 }
  0x40   : > { %516 = vmatprep.subr.bf16.mxu0 %v746_v1 }
  0x43   : > { %517 = vmatpush1.bf16.msra.mxu0 %v728_v41 }
  0x44   : > { %518 = vmatprep.subr.bf16.mxu0 %v746_v1 }
  0x47   : > { %519 = vmatpush1.bf16.msra.mxu0 %v730_v42 }
  0x48   : > { %520 = vmatprep.subr.bf16.mxu0 %v746_v1 }
  0x4b   : > { %521 = vmatpush1.bf16.msra.mxu0 %v732_v43 }
  0x4c   : > { %522 = vmatprep.subr.bf16.mxu0 %v746_v1 }
  0x4f   : > { %523 = vmatpush1.bf16.msra.mxu0 %v734_v44 }
  0x50   : > { %524 = vmatprep.subr.bf16.mxu0 %v746_v1 }
  0x53   : > { %525 = vmatpush1.bf16.msra.mxu0 %v737_v45 }
  0x56   : > { %539 = vmatmul.mubr.bf16.vlgmr.msra.gmra.mrb[0].mxu0 %v440_v46 }
 0x103   : > { %v307_v47 = vpop.f32.mrb[0].mxu1 }
 0x104   : > { %v309_v48 = vpop.f32.mrb[1].mxu1 }
 0x105   : > { %v310_v49 = vpop.f32.mrb[2].mxu1 }
 0x106   : > { %v311_v50 = vpop.f32.mrb[3].mxu1 }
 0x129   : > { %v540_v51 = vpop.f32.mrb[0].mxu0 }
 0x12a   : > { %v690_v52 = vadd.f32 %v540_v51, %v307_v47  ;;  %v542_v53 = vpop.f32.mrb[1].mxu0 }
 0x12b   : > { %v543_v54 = vpop.f32.mrb[2].mxu0 }
 0x12c   : > { %v547_v55 = vpack.c.bf16 %v690_v52, %v690_v52  ;;  %v544_v56 = vpop.f32.mrb[3].mxu0 }
 0x12e   : > { %548 = vst [vmem:[%s141_s26] sm:$0xf] %v547_v55 }
 0x12f PF: > { %s12_s9 = sadd.s32 1, %s744_s9  }
 0x130   : > { %p9_p4 = scmp.ge.s32.totalorder %s12_s9, 4  }
 0x132   :  { %11 = sbr.rel (!%p9_p4) target bundleno = 1 (0x1), region = 60 }

// kernel: fpn_feature_expander_forward.13
= control target key start
LH: loop header
LB: loop body
LE: loop exit
PB: predicated region body
PF: predicated region fallthrough
CT: control target
= control target key end

     0   :  { %s668_s9 = smov 0   ;;  %s770_s0 = inlined_call_operand.vmem [shape: bf16[2,1,6,96], index: 0, kind: input, shape index: {}]   ;;  %s771_s1 = inlined_call_operand.vmem [shape: bf16[3,96,64], index: 1, kind: input, shape index: {}]   ;;  %s772_s2 = inlined_call_operand.vmem [shape: bf16[2,4,64], index: 2, kind: output, shape index: {}]  }
   0x1 LB: > { %s485_s10 = sadd.s32 4294967295, %s649_s9   ;;  %p489_p0 = scmp.ge.s32.totalorder %s649_s9, 1  ;;  %s649_s9 = sphi %s668_s9, %s12_s9  }
   0x2   : > { %p111_p1 = scmp.lt.s32.totalorder %s649_s9, 3 }
   0x4   : > { %p112_p2 = pnand %p489_p0, %p111_p1 }
   0x5   : > { %v624_v0 = vld [vmem:[%s771_s1] sm:$0xff] (!%p112_p2)   ;;  %v651_v1 = vmov (!%p112_p2), 0.0   ;;  %v625_v2 = vld [vmem:[%s771_s1 + $0x8] sm:$0xff] (!%p112_p2)   ;;  %vm652_vm0 = vmmov (!%p112_p2), 0   ;;  %p131_p3 = scmp.lt.s32.totalorder (!%p112_p2), %s485_s10, 1  ;;  %v626_v3 = vld [vmem:[%s771_s1 + $0x10] sm:$0xff] (!%p112_p2)  }
   0x6   : > { %115 = sbr.rel (%p112_p2) target bundleno = 271 (0x10f), region = 28  ;;  %577 = vmatprep.subr.bf16.mxu0 (!%p112_p2), %v651_v1  ;;  %561 = vmatprep.subr.bf16.mxu1 (!%p112_p2), %v651_v1  ;;  %v630_v4 = vld [vmem:[%s771_s1 + $0x30] sm:$0xff] (!%p112_p2)   ;;  %v633_v5 = vld [vmem:[%s771_s1 + $0x38] sm:$0xff] (!%p112_p2)   ;;  %v635_v7 = vld [vmem:[%s771_s1 + $0x40] sm:$0xff] (!%p112_p2)   ;;  %vm212_vm1 = vcmask (!%p112_p2), 785408   ;;  %vm430_vm2 = vcmask (!%p112_p2), 517120  }
   0x7   : > { %578 = vmatpush3.bf16.msra.mxu0 (!%p112_p2), %v624_v0  ;;  %589 = vmatprep.mubr.msk.bf16.mxu0 (!%p112_p2), %vm652_vm0, %v651_v1  ;;  %v627_v6 = vld [vmem:[%s771_s1 + $0x18] sm:$0xff] (!%p112_p2)   ;;  %v628_v8 = vld [vmem:[%s771_s1 + $0x20] sm:$0xff] (!%p112_p2)   ;;  %v637_v11 = vld [vmem:[%s771_s1 + $0x48] sm:$0xff] (!%p112_p2)  }
   0x8   : > { %579 = vmatprep.subr.bf16.mxu0 (!%p112_p2), %v651_v1  ;;  %573 = vmatprep.mubr.msk.bf16.mxu1 (!%p112_p2), %vm652_vm0, %v651_v1  ;;  %v629_v12 = vld [vmem:[%s771_s1 + $0x28] sm:$0xff] (!%p112_p2)   ;;  %v639_v14 = vld [vmem:[%s771_s1 + $0x50] sm:$0xff] (!%p112_p2)   ;;  %v632_v15 = vld [vmem:[%s771_s1 + $0x60] sm:$0xff] (!%p112_p2)  }
   0x9   : > { %562 = vmatpush3.bf16.msra.mxu1 (!%p112_p2), %v630_v4  ;;  %v641_v18 = vld [vmem:[%s771_s1 + $0x58] sm:$0xff] (!%p112_p2)   ;;  %v634_v19 = vld [vmem:[%s771_s1 + $0x68] sm:$0xff] (!%p112_p2)   ;;  %v636_v21 = vld [vmem:[%s771_s1 + $0x70] sm:$0xff] (!%p112_p2)  }
   0xa   : > { %563 = vmatprep.subr.bf16.mxu1 (!%p112_p2), %v651_v1  ;;  %v638_v22 = vld [vmem:[%s771_s1 + $0x78] sm:$0xff] (!%p112_p2)   ;;  %v640_v23 = vld [vmem:[%s771_s1 + $0x80] sm:$0xff] (!%p112_p2)   ;;  %v642_v24 = vld [vmem:[%s771_s1 + $0x88] sm:$0xff] (!%p112_p2)  }
   0xb   : > { %580 = vmatpush3.bf16.msra.mxu0 (!%p112_p2), %v625_v2 }
   0xc   : > { %581 = vmatprep.subr.bf16.mxu0 (!%p112_p2), %v651_v1 }
   0xd   : > { %s774_s10 = smov (!%p131_p3, %s485_s10), 1  ;;  %564 = vmatpush3.bf16.msra.mxu1 %v633_v5 }
   0xe   : > { %s490_s19 = sshll.u32 %s774_s10, 2  ;;  %565 = vmatprep.subr.bf16.mxu1 %v651_v1  ;;  %s491_s25 = sshll.u32 %s774_s10, 1 }
   0xf   : > { %582 = vmatpush3.bf16.msra.mxu0 %v626_v3  ;;  %s134_s26 = scalar_lea.vmem %s770_s0, %s490_s19  ;;  %s138_s28 = scalar_lea.vmem %s772_s2, %s491_s25 }
  0x10   : > { %583 = vmatprep.subr.bf16.mxu0 %v651_v1  ;;  %v140_v9 = vld [vmem:[%s134_s26] sm:$0x7] }
  0x11   : > { %v504_v10 = vcombine.low %v140_v9, %v140_v9  ;;  %566 = vmatpush3.bf16.msra.mxu1 %v635_v7 }
  0x12   : > { %567 = vmatprep.subr.bf16.mxu1 %v651_v1 }
  0x13   : > { %584 = vmatpush3.bf16.msra.mxu0 %v627_v6  ;;  %v172_v13 = vshll.u32 %v504_v10, 16  ;;  %v170_v16 = vshrl.u32 %v504_v10, 16  ;;  %v348_v25 = vrot.slane %v504_v10, 1 }
  0x14   : > { %585 = vmatprep.subr.bf16.mxu0 %v651_v1 }
  0x15   : > { %568 = vmatpush3.bf16.msra.mxu1 %v637_v11  ;;  %v174_v17 = vrot.slane %v172_v13, 1 }
  0x16   : > { %569 = vmatprep.subr.bf16.mxu1 %v651_v1 }
  0x17   : > { %586 = vmatpush3.bf16.msra.mxu0 %v628_v8  ;;  %v175_v20 = vor.u32 %v174_v17, %v170_v16 }
  0x18   : > { %587 = vmatprep.subr.bf16.mxu0 %v651_v1 }
  0x19   : > { %570 = vmatpush3.bf16.msra.mxu1 %v639_v14 }
  0x1a   : > { %571 = vmatprep.subr.bf16.mxu1 %v651_v1 }
  0x1b   : > { %588 = vmatpush3.bf16.msra.mxu0 %v629_v12 }
  0x1c   : > { %593 = vmatprep.subr.bf16.mxu0 %v651_v1 }
  0x1d   : > { %572 = vmatpush3.bf16.msra.mxu1 %v641_v18 }
  0x1e   : > { %590 = vmatmul.mubr.msk.bf16.vlgmr.msra.gmra.mrb[0].mxu0 %vm212_vm1, %v140_v9 }
  0x1f   : > { %594 = vmatpush3.bf16.msra.mxu0 %v632_v15  ;;  %605 = vmatprep.mubr.msk.bf16.mxu0 %vm652_vm0, %v651_v1 }
  0x20   : > { %595 = vmatprep.subr.bf16.mxu0 %v651_v1  ;;  %574 = vmatmul.mubr.msk.bf16.vlgmr.msra.gmra.mrb[0].mxu1 %vm212_vm1, %v175_v20 }
  0x23   : > { %596 = vmatpush3.bf16.msra.mxu0 %v634_v19 }
  0x24   : > { %597 = vmatprep.subr.bf16.mxu0 %v651_v1 }
  0x27   : > { %598 = vmatpush3.bf16.msra.mxu0 %v636_v21 }
  0x28   : > { %599 = vmatprep.subr.bf16.mxu0 %v651_v1 }
  0x2b   : > { %600 = vmatpush3.bf16.msra.mxu0 %v638_v22 }
  0x2c   : > { %601 = vmatprep.subr.bf16.mxu0 %v651_v1 }
  0x2f   : > { %602 = vmatpush3.bf16.msra.mxu0 %v640_v23 }
  0x30   : > { %603 = vmatprep.subr.bf16.mxu0 %v651_v1 }
  0x33   : > { %604 = vmatpush3.bf16.msra.mxu0 %v642_v24 }
  0x36   : > { %606 = vmatmul.mubr.msk.bf16.vlgmr.msra.gmra.mrb[0].mxu0 %vm212_vm1, %v348_v25 }
  0xf3   : > { %v250_v26 = vpop.f32.mrb[0].mxu1 }
  0xf4   : > { %v575_v27 = vpop.f32.mrb[1].mxu1 }
  0xf5   : > { %v253_v28 = vpop.f32.mrb[2].mxu1 }
  0xf6   : > { %v576_v29 = vpop.f32.mrb[3].mxu1 }
 0x109   : > { %v422_v30 = vpop.f32.mrb[0].mxu0 }
 0x10a   : > { %v609_v31 = vadd.f32 %v422_v30, %v250_v26  ;;  %v607_v32 = vpop.f32.mrb[1].mxu0 }
 0x10b   : > { %v425_v33 = vpop.f32.mrb[2].mxu0 }
 0x10c   : > { %v429_v34 = vpack.c.bf16 %v609_v31, %v609_v31  ;;  %v608_v35 = vpop.f32.mrb[3].mxu0 }
 0x10e   : > { %431 = vst.msk [vmem:[%s138_s28] sm:$0x3] %vm430_vm2, %v429_v34 }
 0x10f PF: > { %s12_s9 = sadd.s32 1, %s649_s9  }
 0x110   : > { %p9_p4 = scmp.ge.s32.totalorder %s12_s9, 4  }
 0x112   :  { %11 = sbr.rel (!%p9_p4) target bundleno = 1 (0x1), region = 60 }

</bundles_post_ra>
